<compile_context>
chip_gen: v6e
topology: v6e:2x2x1
jax: 0.10.0
libtpu: 0.0.40
codegen_flags: <defaults>
</compile_context>

<pallas_src>
import functools

import jax
import jax.numpy as jnp
from jax.experimental import pallas as pl


def _lstm_kernel(x_ref,      # (Bp, T*D)  bf16, batch-major, free-reshaped
                 wih0_ref,   # (D, 4H)    bf16
                 b0_ref,     # (1, 4H)    f32   (b_ih0 + b_hh0)
                 wcat_ref,   # (H, 8H)    bf16  ([W_hh0 | W_ih1])
                 whh1_ref,   # (H, 4H)    bf16
                 b1_ref,     # (1, 4H)    f32   (b_ih1 + b_hh1)
                 wlin_ref,   # (H, O)     bf16
                 blin_ref,   # (1, O)     f32
                 out_ref,    # (Bp, O)    f32
                 *, T):
    bf16 = jnp.bfloat16
    f32 = jnp.float32
    Bp = x_ref.shape[0]
    D = x_ref.shape[1] // T
    H = whh1_ref.shape[0]
    G = 4 * H

    x = x_ref[...]                         # (Bp, T*D) bf16
    wih0 = wih0_ref[...]
    wcat = wcat_ref[...]
    whh1 = whh1_ref[...]
    b0b = jnp.broadcast_to(b0_ref[...], (Bp, G))   # hoisted broadcasts
    b1b = jnp.broadcast_to(b1_ref[...], (Bp, G))

    # ---- hoisted layer-0 input projection (bias folded in) -----------------
    # T small independent dots issued before the recurrence; none of them sit
    # on the serial chain (x is loop-invariant, loop is unrolled).
    xw0 = [jnp.dot(x[:, t * D:(t + 1) * D], wih0,
                   preferred_element_type=f32) + b0b
           for t in range(T)]

    def cell_update(gates, c):
        # Gate layout (PyTorch order): [i | f | g | o], each width H.
        # One full-width sigmoid + one tanh on the g band: 2 EUP pushes/cell.
        sg = jax.nn.sigmoid(gates)
        i = sg[:, 0 * H:1 * H]
        f = sg[:, 1 * H:2 * H]
        o = sg[:, 3 * H:4 * H]
        g = jnp.tanh(gates[:, 2 * H:3 * H])
        c_new = f * c + i * g
        h_new = o * jnp.tanh(c_new)
        return h_new, c_new

    zH = jnp.zeros((Bp, H), f32)
    c0, h1, c1 = zH, zH, zH
    r0 = jnp.zeros((Bp, G), f32)   # h0(-1) @ W_hh0 = 0
    r1 = b1b                       # h1(-1) @ W_hh1 + b1

    # Fully unrolled time loop (T static): static slices, full scheduler
    # visibility.  Per-step serial chain through h0: one fused dot + one cell.
    for t in range(T):
        # layer-0 cell: recurrent contribution r0 was produced by the fused
        # dot of the previous step.
        g0 = xw0[t] + r0
        h0, c0 = cell_update(g0, c0)

        # fused cross-layer dot: [ h0 @ W_hh0 (for t+1) | h0 @ W_ih1 (now) ]
        comb = jnp.dot(h0.astype(bf16), wcat, preferred_element_type=f32)
        r0 = comb[:, :G]           # unused at t == T-1 (discarded)

        # layer-1 cell: r1 = h1(t-1) @ W_hh1 + b1 was computed off-chain.
        g1 = comb[:, G:] + r1
        h1, c1 = cell_update(g1, c1)
        if t + 1 < T:
            r1 = jnp.dot(h1.astype(bf16), whh1,
                         preferred_element_type=f32) + b1b

    # final Linear on the last time step's top-layer hidden state
    out_ref[...] = (jnp.dot(h1.astype(bf16), wlin_ref[...],
                            preferred_element_type=f32)
                    + blin_ref[...])


def _full_spec(shape):
    nd = len(shape)
    return pl.BlockSpec(shape, lambda *_: (0,) * nd)


@jax.jit
def lstm_model_forward(x_btd, params):
    """x_btd: (B, T, D) batch_first input, like the PyTorch module."""
    B, T, D = x_btd.shape
    O = params["wlin"].shape[1]

    # Pad batch to a multiple of 8 (>=8): fills sublanes / MXU rows; padded
    # rows are independent and sliced off below.
    Bp = max(8, -(-B // 8) * 8)
    xb = x_btd.astype(jnp.bfloat16)
    if Bp != B:
        xb = jnp.pad(xb, ((0, Bp - B), (0, 0), (0, 0)))
    # Free reshape (no transpose, no extra HBM pass): row b keeps its own
    # [x(b,0,:) ... x(b,T-1,:)] lane-concatenated.
    x2 = xb.reshape(Bp, T * D)

    args = (x2, params["wih0"], params["b0"], params["wcat"],
            params["whh1"], params["b1"], params["wlin"], params["blin"])

    # NOTE: everything is VMEM-resident (tiny at H=32).  At production sizes
    # tile the 4H weight axis via a grid (reduction axis last) and add a
    # "parallel" batch grid axis; size tiles for v7x's 64 MiB VMEM and v5e's
    # 16 MiB default scoped limit (raise vmem_limit_bytes as needed).
    out = pl.pallas_call(
        functools.partial(_lstm_kernel, T=T),
        out_shape=jax.ShapeDtypeStruct((Bp, O), jnp.float32),
        in_specs=[_full_spec(a.shape) for a in args],
        out_specs=_full_spec((Bp, O)),
    )(*args)
    return out[:B]


def init_params(key, input_size, hidden, output_size):
    """Deterministic init mirroring PyTorch LSTM/Linear uniform(-k, k).

    Weights are pre-transposed to (K, 4H) layout; the layer-0 recurrent and
    layer-1 input weights are pre-concatenated into Wcat = [W_hh0 | W_ih1]
    (H, 8H) for the fused cross-layer dot.  Matmul operands are stored in
    bfloat16; biases stay float32.
    """
    k = 1.0 / jnp.sqrt(jnp.float32(hidden))
    keys = jax.random.split(key, 12)

    def u(kk, shape):
        return jax.random.uniform(kk, shape, jnp.float32, -k, k)

    # PyTorch stores W_ih (4H, D) / W_hh (4H, H); pre-transpose to (K, 4H).
    wih0 = u(keys[0], (4 * hidden, input_size)).T          # (D, 4H)
    whh0 = u(keys[1], (4 * hidden, hidden)).T              # (H, 4H)
    b0 = (u(keys[2], (4 * hidden,)) + u(keys[3], (4 * hidden,)))[None, :]
    wih1 = u(keys[4], (4 * hidden, hidden)).T              # (H, 4H)
    whh1 = u(keys[5], (4 * hidden, hidden)).T              # (H, 4H)
    b1 = (u(keys[6], (4 * hidden,)) + u(keys[7], (4 * hidden,)))[None, :]
    wcat = jnp.concatenate([whh0, wih1], axis=1)           # (H, 8H)
    wlin = u(keys[8], (output_size, hidden)).T              # (H, O)
    blin = u(keys[9], (output_size,))[None, :]

    bf16 = jnp.bfloat16
    return dict(wih0=wih0.astype(bf16), b0=b0,
                wcat=wcat.astype(bf16), whh1=whh1.astype(bf16), b1=b1,
                wlin=wlin.astype(bf16), blin=blin)


def reference_forward(x_btd, params, matmul_dtype=jnp.bfloat16):
    """Pure-JAX reference of the 2-layer batch_first LSTM + Linear (eval)."""
    B, T, _ = x_btd.shape
    H = params["whh1"].shape[0]
    G = 4 * H
    whh0 = params["wcat"][:, :G]
    wih1 = params["wcat"][:, G:]

    def mm(a, b):
        return jnp.dot(a.astype(matmul_dtype), b.astype(matmul_dtype),
                       preferred_element_type=jnp.float32)

    def cell(gates, c):
        i = jax.nn.sigmoid(gates[:, 0 * H:1 * H])
        f = jax.nn.sigmoid(gates[:, 1 * H:2 * H])
        g = jnp.tanh(gates[:, 2 * H:3 * H])
        o = jax.nn.sigmoid(gates[:, 3 * H:4 * H])
        c = f * c + i * g
        return o * jnp.tanh(c), c

    z = jnp.zeros((B, H), jnp.float32)
    h0 = c0 = h1 = c1 = z
    for t in range(T):
        x_t = x_btd[:, t, :]
        g0 = (mm(x_t, params["wih0"]) + params["b0"]) + mm(h0, whh0)
        h0, c0 = cell(g0, c0)
        g1 = mm(h0, wih1) + (mm(h1, params["whh1"]) + params["b1"])
        h1, c1 = cell(g1, c1)
    return mm(h1, params["wlin"]) + params["blin"]


if __name__ == "__main__":
    # Small shapes consistent with the module's forward:
    # input_seq: (batch, seq_len, input_size)
    B, T, D, H, O = 2, 8, 4, 32, 1

    key = jax.random.PRNGKey(0)
    k_x, k_p = jax.random.split(key)
    x = jax.random.normal(k_x, (B, T, D), jnp.float32)
    params = init_params(k_p, input_size=D, hidden=H, output_size=O)

    out = jax.block_until_ready(lstm_model_forward(x, params))
    assert out.shape == (B, O), out.shape

    # Tight check vs a pure-JAX reference using the same bf16-MXU / f32-accum
    # math and the same op decomposition.
    ref = reference_forward(x, params)
    assert jnp.allclose(out, ref, rtol=1e-3, atol=1e-4), (out, ref)

    # Loose sanity check vs an all-f32 reference (bf16 matmul operands only
    # introduce ~1% error through 8 recurrent steps).
    ref_f32 = reference_forward(x, params, matmul_dtype=jnp.float32)
    assert jnp.allclose(out, ref_f32, rtol=5e-2, atol=5e-2), (out, ref_f32)

    print("KERNEL_OK")
</pallas_src>

<mosaic_0001>
module attributes {stable_mosaic.version = 11 : i64} {
  func.func @_lstm_kernel(%arg0: memref<8x32xbf16, #tpu.memory_space<vmem>>, %arg1: memref<4x128xbf16, #tpu.memory_space<vmem>>, %arg2: memref<1x128xf32, #tpu.memory_space<vmem>>, %arg3: memref<32x256xbf16, #tpu.memory_space<vmem>>, %arg4: memref<32x128xbf16, #tpu.memory_space<vmem>>, %arg5: memref<1x128xf32, #tpu.memory_space<vmem>>, %arg6: memref<32x1xbf16, #tpu.memory_space<vmem>>, %arg7: memref<1x1xf32, #tpu.memory_space<vmem>>, %arg8: memref<8x1xf32, #tpu.memory_space<vmem>>) attributes {dimension_semantics = [], scalar_prefetch = 0 : i64, scratch_operands = 0 : i64, tpu.core_type = #tpu.core_type<tc>} {
    %c0 = arith.constant 0 : index
    %c0_0 = arith.constant 0 : index
    %0 = vector.load %arg0[%c0, %c0_0] : memref<8x32xbf16, #tpu.memory_space<vmem>>, vector<8x32xbf16>
    %c0_1 = arith.constant 0 : index
    %c0_2 = arith.constant 0 : index
    %1 = vector.load %arg1[%c0_1, %c0_2] : memref<4x128xbf16, #tpu.memory_space<vmem>>, vector<4x128xbf16>
    %c0_3 = arith.constant 0 : index
    %c0_4 = arith.constant 0 : index
    %2 = vector.load %arg3[%c0_3, %c0_4] : memref<32x256xbf16, #tpu.memory_space<vmem>>, vector<32x256xbf16>
    %c0_5 = arith.constant 0 : index
    %c0_6 = arith.constant 0 : index
    %3 = vector.load %arg4[%c0_5, %c0_6] : memref<32x128xbf16, #tpu.memory_space<vmem>>, vector<32x128xbf16>
    %c0_7 = arith.constant 0 : index
    %c0_8 = arith.constant 0 : index
    %4 = vector.load %arg2[%c0_7, %c0_8] : memref<1x128xf32, #tpu.memory_space<vmem>>, vector<1x128xf32>
    %5 = vector.shape_cast %4 : vector<1x128xf32> to vector<1x128xf32>
    %6 = vector.broadcast %5 : vector<1x128xf32> to vector<8x128xf32>
    %c0_9 = arith.constant 0 : index
    %c0_10 = arith.constant 0 : index
    %7 = vector.load %arg5[%c0_9, %c0_10] : memref<1x128xf32, #tpu.memory_space<vmem>>, vector<1x128xf32>
    %8 = vector.shape_cast %7 : vector<1x128xf32> to vector<1x128xf32>
    %9 = vector.broadcast %8 : vector<1x128xf32> to vector<8x128xf32>
    %10 = vector.extract_strided_slice %0 {offsets = [0, 0], sizes = [8, 4], strides = [1, 1]} : vector<8x32xbf16> to vector<8x4xbf16>
    %cst = arith.constant dense<0.000000e+00> : vector<8x128xf32>
    %11 = tpu.matmul %10, %1, %cst {dimension_numbers = #tpu.dot_dimension_numbers<[1], [0], [0], [1], [0, 0, 1, 1], [], []>} : vector<8x4xbf16>, vector<4x128xbf16>, vector<8x128xf32> -> vector<8x128xf32>
    %12 = arith.addf %11, %6 : vector<8x128xf32>
    %13 = vector.extract_strided_slice %0 {offsets = [0, 4], sizes = [8, 4], strides = [1, 1]} : vector<8x32xbf16> to vector<8x4xbf16>
    %cst_11 = arith.constant dense<0.000000e+00> : vector<8x128xf32>
    %14 = tpu.matmul %13, %1, %cst_11 {dimension_numbers = #tpu.dot_dimension_numbers<[1], [0], [0], [1], [0, 0, 1, 1], [], []>} : vector<8x4xbf16>, vector<4x128xbf16>, vector<8x128xf32> -> vector<8x128xf32>
    %15 = arith.addf %14, %6 : vector<8x128xf32>
    %16 = vector.extract_strided_slice %0 {offsets = [0, 8], sizes = [8, 4], strides = [1, 1]} : vector<8x32xbf16> to vector<8x4xbf16>
    %cst_12 = arith.constant dense<0.000000e+00> : vector<8x128xf32>
    %17 = tpu.matmul %16, %1, %cst_12 {dimension_numbers = #tpu.dot_dimension_numbers<[1], [0], [0], [1], [0, 0, 1, 1], [], []>} : vector<8x4xbf16>, vector<4x128xbf16>, vector<8x128xf32> -> vector<8x128xf32>
    %18 = arith.addf %17, %6 : vector<8x128xf32>
    %19 = vector.extract_strided_slice %0 {offsets = [0, 12], sizes = [8, 4], strides = [1, 1]} : vector<8x32xbf16> to vector<8x4xbf16>
    %cst_13 = arith.constant dense<0.000000e+00> : vector<8x128xf32>
    %20 = tpu.matmul %19, %1, %cst_13 {dimension_numbers = #tpu.dot_dimension_numbers<[1], [0], [0], [1], [0, 0, 1, 1], [], []>} : vector<8x4xbf16>, vector<4x128xbf16>, vector<8x128xf32> -> vector<8x128xf32>
    %21 = arith.addf %20, %6 : vector<8x128xf32>
    %22 = vector.extract_strided_slice %0 {offsets = [0, 16], sizes = [8, 4], strides = [1, 1]} : vector<8x32xbf16> to vector<8x4xbf16>
    %cst_14 = arith.constant dense<0.000000e+00> : vector<8x128xf32>
    %23 = tpu.matmul %22, %1, %cst_14 {dimension_numbers = #tpu.dot_dimension_numbers<[1], [0], [0], [1], [0, 0, 1, 1], [], []>} : vector<8x4xbf16>, vector<4x128xbf16>, vector<8x128xf32> -> vector<8x128xf32>
    %24 = arith.addf %23, %6 : vector<8x128xf32>
    %25 = vector.extract_strided_slice %0 {offsets = [0, 20], sizes = [8, 4], strides = [1, 1]} : vector<8x32xbf16> to vector<8x4xbf16>
    %cst_15 = arith.constant dense<0.000000e+00> : vector<8x128xf32>
    %26 = tpu.matmul %25, %1, %cst_15 {dimension_numbers = #tpu.dot_dimension_numbers<[1], [0], [0], [1], [0, 0, 1, 1], [], []>} : vector<8x4xbf16>, vector<4x128xbf16>, vector<8x128xf32> -> vector<8x128xf32>
    %27 = arith.addf %26, %6 : vector<8x128xf32>
    %28 = vector.extract_strided_slice %0 {offsets = [0, 24], sizes = [8, 4], strides = [1, 1]} : vector<8x32xbf16> to vector<8x4xbf16>
    %cst_16 = arith.constant dense<0.000000e+00> : vector<8x128xf32>
    %29 = tpu.matmul %28, %1, %cst_16 {dimension_numbers = #tpu.dot_dimension_numbers<[1], [0], [0], [1], [0, 0, 1, 1], [], []>} : vector<8x4xbf16>, vector<4x128xbf16>, vector<8x128xf32> -> vector<8x128xf32>
    %30 = arith.addf %29, %6 : vector<8x128xf32>
    %31 = vector.extract_strided_slice %0 {offsets = [0, 28], sizes = [8, 4], strides = [1, 1]} : vector<8x32xbf16> to vector<8x4xbf16>
    %cst_17 = arith.constant dense<0.000000e+00> : vector<8x128xf32>
    %32 = tpu.matmul %31, %1, %cst_17 {dimension_numbers = #tpu.dot_dimension_numbers<[1], [0], [0], [1], [0, 0, 1, 1], [], []>} : vector<8x4xbf16>, vector<4x128xbf16>, vector<8x128xf32> -> vector<8x128xf32>
    %33 = arith.addf %32, %6 : vector<8x128xf32>
    %cst_18 = arith.constant 0.000000e+00 : f32
    %34 = vector.broadcast %cst_18 : f32 to vector<8x32xf32>
    %cst_19 = arith.constant 0.000000e+00 : f32
    %35 = vector.broadcast %cst_19 : f32 to vector<8x128xf32>
    %36 = arith.addf %12, %35 : vector<8x128xf32>
    %37 = arith.negf %36 : vector<8x128xf32>
    %38 = math.exp %37 : vector<8x128xf32>
    %cst_20 = arith.constant 1.000000e+00 : f32
    %39 = vector.broadcast %cst_20 : f32 to vector<8x128xf32>
    %40 = arith.addf %39, %38 : vector<8x128xf32>
    %41 = arith.divf %39, %40 : vector<8x128xf32>
    %42 = vector.extract_strided_slice %41 {offsets = [0, 0], sizes = [8, 32], strides = [1, 1]} : vector<8x128xf32> to vector<8x32xf32>
    %43 = vector.extract_strided_slice %41 {offsets = [0, 32], sizes = [8, 32], strides = [1, 1]} : vector<8x128xf32> to vector<8x32xf32>
    %44 = vector.extract_strided_slice %41 {offsets = [0, 96], sizes = [8, 32], strides = [1, 1]} : vector<8x128xf32> to vector<8x32xf32>
    %45 = vector.extract_strided_slice %36 {offsets = [0, 64], sizes = [8, 32], strides = [1, 1]} : vector<8x128xf32> to vector<8x32xf32>
    %46 = math.tanh %45 : vector<8x32xf32>
    %47 = arith.mulf %43, %34 : vector<8x32xf32>
    %48 = arith.mulf %42, %46 : vector<8x32xf32>
    %49 = arith.addf %47, %48 : vector<8x32xf32>
    %50 = math.tanh %49 : vector<8x32xf32>
    %51 = arith.mulf %44, %50 : vector<8x32xf32>
    %52 = arith.truncf %51 : vector<8x32xf32> to vector<8x32xbf16>
    %cst_21 = arith.constant dense<0.000000e+00> : vector<8x256xf32>
    %53 = tpu.matmul %52, %2, %cst_21 {dimension_numbers = #tpu.dot_dimension_numbers<[1], [0], [0], [1], [0, 0, 1, 1], [], []>} : vector<8x32xbf16>, vector<32x256xbf16>, vector<8x256xf32> -> vector<8x256xf32>
    %54 = vector.extract_strided_slice %53 {offsets = [0, 0], sizes = [8, 128], strides = [1, 1]} : vector<8x256xf32> to vector<8x128xf32>
    %55 = vector.extract_strided_slice %53 {offsets = [0, 128], sizes = [8, 128], strides = [1, 1]} : vector<8x256xf32> to vector<8x128xf32>
    %56 = arith.addf %55, %9 : vector<8x128xf32>
    %57 = arith.negf %56 : vector<8x128xf32>
    %58 = math.exp %57 : vector<8x128xf32>
    %cst_22 = arith.constant 1.000000e+00 : f32
    %59 = vector.broadcast %cst_22 : f32 to vector<8x128xf32>
    %60 = arith.addf %59, %58 : vector<8x128xf32>
    %61 = arith.divf %59, %60 : vector<8x128xf32>
    %62 = vector.extract_strided_slice %61 {offsets = [0, 0], sizes = [8, 32], strides = [1, 1]} : vector<8x128xf32> to vector<8x32xf32>
    %63 = vector.extract_strided_slice %61 {offsets = [0, 32], sizes = [8, 32], strides = [1, 1]} : vector<8x128xf32> to vector<8x32xf32>
    %64 = vector.extract_strided_slice %61 {offsets = [0, 96], sizes = [8, 32], strides = [1, 1]} : vector<8x128xf32> to vector<8x32xf32>
    %65 = vector.extract_strided_slice %56 {offsets = [0, 64], sizes = [8, 32], strides = [1, 1]} : vector<8x128xf32> to vector<8x32xf32>
    %66 = math.tanh %65 : vector<8x32xf32>
    %67 = arith.mulf %63, %34 : vector<8x32xf32>
    %68 = arith.mulf %62, %66 : vector<8x32xf32>
    %69 = arith.addf %67, %68 : vector<8x32xf32>
    %70 = math.tanh %69 : vector<8x32xf32>
    %71 = arith.mulf %64, %70 : vector<8x32xf32>
    %72 = arith.truncf %71 : vector<8x32xf32> to vector<8x32xbf16>
    %cst_23 = arith.constant dense<0.000000e+00> : vector<8x128xf32>
    %73 = tpu.matmul %72, %3, %cst_23 {dimension_numbers = #tpu.dot_dimension_numbers<[1], [0], [0], [1], [0, 0, 1, 1], [], []>} : vector<8x32xbf16>, vector<32x128xbf16>, vector<8x128xf32> -> vector<8x128xf32>
    %74 = arith.addf %73, %9 : vector<8x128xf32>
    %75 = arith.addf %15, %54 : vector<8x128xf32>
    %76 = arith.negf %75 : vector<8x128xf32>
    %77 = math.exp %76 : vector<8x128xf32>
    %cst_24 = arith.constant 1.000000e+00 : f32
    %78 = vector.broadcast %cst_24 : f32 to vector<8x128xf32>
    %79 = arith.addf %78, %77 : vector<8x128xf32>
    %80 = arith.divf %78, %79 : vector<8x128xf32>
    %81 = vector.extract_strided_slice %80 {offsets = [0, 0], sizes = [8, 32], strides = [1, 1]} : vector<8x128xf32> to vector<8x32xf32>
    %82 = vector.extract_strided_slice %80 {offsets = [0, 32], sizes = [8, 32], strides = [1, 1]} : vector<8x128xf32> to vector<8x32xf32>
    %83 = vector.extract_strided_slice %80 {offsets = [0, 96], sizes = [8, 32], strides = [1, 1]} : vector<8x128xf32> to vector<8x32xf32>
    %84 = vector.extract_strided_slice %75 {offsets = [0, 64], sizes = [8, 32], strides = [1, 1]} : vector<8x128xf32> to vector<8x32xf32>
    %85 = math.tanh %84 : vector<8x32xf32>
    %86 = arith.mulf %82, %49 : vector<8x32xf32>
    %87 = arith.mulf %81, %85 : vector<8x32xf32>
    %88 = arith.addf %86, %87 : vector<8x32xf32>
    %89 = math.tanh %88 : vector<8x32xf32>
    %90 = arith.mulf %83, %89 : vector<8x32xf32>
    %91 = arith.truncf %90 : vector<8x32xf32> to vector<8x32xbf16>
    %cst_25 = arith.constant dense<0.000000e+00> : vector<8x256xf32>
    %92 = tpu.matmul %91, %2, %cst_25 {dimension_numbers = #tpu.dot_dimension_numbers<[1], [0], [0], [1], [0, 0, 1, 1], [], []>} : vector<8x32xbf16>, vector<32x256xbf16>, vector<8x256xf32> -> vector<8x256xf32>
    %93 = vector.extract_strided_slice %92 {offsets = [0, 0], sizes = [8, 128], strides = [1, 1]} : vector<8x256xf32> to vector<8x128xf32>
    %94 = vector.extract_strided_slice %92 {offsets = [0, 128], sizes = [8, 128], strides = [1, 1]} : vector<8x256xf32> to vector<8x128xf32>
    %95 = arith.addf %94, %74 : vector<8x128xf32>
    %96 = arith.negf %95 : vector<8x128xf32>
    %97 = math.exp %96 : vector<8x128xf32>
    %cst_26 = arith.constant 1.000000e+00 : f32
    %98 = vector.broadcast %cst_26 : f32 to vector<8x128xf32>
    %99 = arith.addf %98, %97 : vector<8x128xf32>
    %100 = arith.divf %98, %99 : vector<8x128xf32>
    %101 = vector.extract_strided_slice %100 {offsets = [0, 0], sizes = [8, 32], strides = [1, 1]} : vector<8x128xf32> to vector<8x32xf32>
    %102 = vector.extract_strided_slice %100 {offsets = [0, 32], sizes = [8, 32], strides = [1, 1]} : vector<8x128xf32> to vector<8x32xf32>
    %103 = vector.extract_strided_slice %100 {offsets = [0, 96], sizes = [8, 32], strides = [1, 1]} : vector<8x128xf32> to vector<8x32xf32>
    %104 = vector.extract_strided_slice %95 {offsets = [0, 64], sizes = [8, 32], strides = [1, 1]} : vector<8x128xf32> to vector<8x32xf32>
    %105 = math.tanh %104 : vector<8x32xf32>
    %106 = arith.mulf %102, %69 : vector<8x32xf32>
    %107 = arith.mulf %101, %105 : vector<8x32xf32>
    %108 = arith.addf %106, %107 : vector<8x32xf32>
    %109 = math.tanh %108 : vector<8x32xf32>
    %110 = arith.mulf %103, %109 : vector<8x32xf32>
    %111 = arith.truncf %110 : vector<8x32xf32> to vector<8x32xbf16>
    %cst_27 = arith.constant dense<0.000000e+00> : vector<8x128xf32>
    %112 = tpu.matmul %111, %3, %cst_27 {dimension_numbers = #tpu.dot_dimension_numbers<[1], [0], [0], [1], [0, 0, 1, 1], [], []>} : vector<8x32xbf16>, vector<32x128xbf16>, vector<8x128xf32> -> vector<8x128xf32>
    %113 = arith.addf %112, %9 : vector<8x128xf32>
    %114 = arith.addf %18, %93 : vector<8x128xf32>
    %115 = arith.negf %114 : vector<8x128xf32>
    %116 = math.exp %115 : vector<8x128xf32>
    %cst_28 = arith.constant 1.000000e+00 : f32
    %117 = vector.broadcast %cst_28 : f32 to vector<8x128xf32>
    %118 = arith.addf %117, %116 : vector<8x128xf32>
    %119 = arith.divf %117, %118 : vector<8x128xf32>
    %120 = vector.extract_strided_slice %119 {offsets = [0, 0], sizes = [8, 32], strides = [1, 1]} : vector<8x128xf32> to vector<8x32xf32>
    %121 = vector.extract_strided_slice %119 {offsets = [0, 32], sizes = [8, 32], strides = [1, 1]} : vector<8x128xf32> to vector<8x32xf32>
    %122 = vector.extract_strided_slice %119 {offsets = [0, 96], sizes = [8, 32], strides = [1, 1]} : vector<8x128xf32> to vector<8x32xf32>
    %123 = vector.extract_strided_slice %114 {offsets = [0, 64], sizes = [8, 32], strides = [1, 1]} : vector<8x128xf32> to vector<8x32xf32>
    %124 = math.tanh %123 : vector<8x32xf32>
    %125 = arith.mulf %121, %88 : vector<8x32xf32>
    %126 = arith.mulf %120, %124 : vector<8x32xf32>
    %127 = arith.addf %125, %126 : vector<8x32xf32>
    %128 = math.tanh %127 : vector<8x32xf32>
    %129 = arith.mulf %122, %128 : vector<8x32xf32>
    %130 = arith.truncf %129 : vector<8x32xf32> to vector<8x32xbf16>
    %cst_29 = arith.constant dense<0.000000e+00> : vector<8x256xf32>
    %131 = tpu.matmul %130, %2, %cst_29 {dimension_numbers = #tpu.dot_dimension_numbers<[1], [0], [0], [1], [0, 0, 1, 1], [], []>} : vector<8x32xbf16>, vector<32x256xbf16>, vector<8x256xf32> -> vector<8x256xf32>
    %132 = vector.extract_strided_slice %131 {offsets = [0, 0], sizes = [8, 128], strides = [1, 1]} : vector<8x256xf32> to vector<8x128xf32>
    %133 = vector.extract_strided_slice %131 {offsets = [0, 128], sizes = [8, 128], strides = [1, 1]} : vector<8x256xf32> to vector<8x128xf32>
    %134 = arith.addf %133, %113 : vector<8x128xf32>
    %135 = arith.negf %134 : vector<8x128xf32>
    %136 = math.exp %135 : vector<8x128xf32>
    %cst_30 = arith.constant 1.000000e+00 : f32
    %137 = vector.broadcast %cst_30 : f32 to vector<8x128xf32>
    %138 = arith.addf %137, %136 : vector<8x128xf32>
    %139 = arith.divf %137, %138 : vector<8x128xf32>
    %140 = vector.extract_strided_slice %139 {offsets = [0, 0], sizes = [8, 32], strides = [1, 1]} : vector<8x128xf32> to vector<8x32xf32>
    %141 = vector.extract_strided_slice %139 {offsets = [0, 32], sizes = [8, 32], strides = [1, 1]} : vector<8x128xf32> to vector<8x32xf32>
    %142 = vector.extract_strided_slice %139 {offsets = [0, 96], sizes = [8, 32], strides = [1, 1]} : vector<8x128xf32> to vector<8x32xf32>
    %143 = vector.extract_strided_slice %134 {offsets = [0, 64], sizes = [8, 32], strides = [1, 1]} : vector<8x128xf32> to vector<8x32xf32>
    %144 = math.tanh %143 : vector<8x32xf32>
    %145 = arith.mulf %141, %108 : vector<8x32xf32>
    %146 = arith.mulf %140, %144 : vector<8x32xf32>
    %147 = arith.addf %145, %146 : vector<8x32xf32>
    %148 = math.tanh %147 : vector<8x32xf32>
    %149 = arith.mulf %142, %148 : vector<8x32xf32>
    %150 = arith.truncf %149 : vector<8x32xf32> to vector<8x32xbf16>
    %cst_31 = arith.constant dense<0.000000e+00> : vector<8x128xf32>
    %151 = tpu.matmul %150, %3, %cst_31 {dimension_numbers = #tpu.dot_dimension_numbers<[1], [0], [0], [1], [0, 0, 1, 1], [], []>} : vector<8x32xbf16>, vector<32x128xbf16>, vector<8x128xf32> -> vector<8x128xf32>
    %152 = arith.addf %151, %9 : vector<8x128xf32>
    %153 = arith.addf %21, %132 : vector<8x128xf32>
    %154 = arith.negf %153 : vector<8x128xf32>
    %155 = math.exp %154 : vector<8x128xf32>
    %cst_32 = arith.constant 1.000000e+00 : f32
    %156 = vector.broadcast %cst_32 : f32 to vector<8x128xf32>
    %157 = arith.addf %156, %155 : vector<8x128xf32>
    %158 = arith.divf %156, %157 : vector<8x128xf32>
    %159 = vector.extract_strided_slice %158 {offsets = [0, 0], sizes = [8, 32], strides = [1, 1]} : vector<8x128xf32> to vector<8x32xf32>
    %160 = vector.extract_strided_slice %158 {offsets = [0, 32], sizes = [8, 32], strides = [1, 1]} : vector<8x128xf32> to vector<8x32xf32>
    %161 = vector.extract_strided_slice %158 {offsets = [0, 96], sizes = [8, 32], strides = [1, 1]} : vector<8x128xf32> to vector<8x32xf32>
    %162 = vector.extract_strided_slice %153 {offsets = [0, 64], sizes = [8, 32], strides = [1, 1]} : vector<8x128xf32> to vector<8x32xf32>
    %163 = math.tanh %162 : vector<8x32xf32>
    %164 = arith.mulf %160, %127 : vector<8x32xf32>
    %165 = arith.mulf %159, %163 : vector<8x32xf32>
    %166 = arith.addf %164, %165 : vector<8x32xf32>
    %167 = math.tanh %166 : vector<8x32xf32>
    %168 = arith.mulf %161, %167 : vector<8x32xf32>
    %169 = arith.truncf %168 : vector<8x32xf32> to vector<8x32xbf16>
    %cst_33 = arith.constant dense<0.000000e+00> : vector<8x256xf32>
    %170 = tpu.matmul %169, %2, %cst_33 {dimension_numbers = #tpu.dot_dimension_numbers<[1], [0], [0], [1], [0, 0, 1, 1], [], []>} : vector<8x32xbf16>, vector<32x256xbf16>, vector<8x256xf32> -> vector<8x256xf32>
    %171 = vector.extract_strided_slice %170 {offsets = [0, 0], sizes = [8, 128], strides = [1, 1]} : vector<8x256xf32> to vector<8x128xf32>
    %172 = vector.extract_strided_slice %170 {offsets = [0, 128], sizes = [8, 128], strides = [1, 1]} : vector<8x256xf32> to vector<8x128xf32>
    %173 = arith.addf %172, %152 : vector<8x128xf32>
    %174 = arith.negf %173 : vector<8x128xf32>
    %175 = math.exp %174 : vector<8x128xf32>
    %cst_34 = arith.constant 1.000000e+00 : f32
    %176 = vector.broadcast %cst_34 : f32 to vector<8x128xf32>
    %177 = arith.addf %176, %175 : vector<8x128xf32>
    %178 = arith.divf %176, %177 : vector<8x128xf32>
    %179 = vector.extract_strided_slice %178 {offsets = [0, 0], sizes = [8, 32], strides = [1, 1]} : vector<8x128xf32> to vector<8x32xf32>
    %180 = vector.extract_strided_slice %178 {offsets = [0, 32], sizes = [8, 32], strides = [1, 1]} : vector<8x128xf32> to vector<8x32xf32>
    %181 = vector.extract_strided_slice %178 {offsets = [0, 96], sizes = [8, 32], strides = [1, 1]} : vector<8x128xf32> to vector<8x32xf32>
    %182 = vector.extract_strided_slice %173 {offsets = [0, 64], sizes = [8, 32], strides = [1, 1]} : vector<8x128xf32> to vector<8x32xf32>
    %183 = math.tanh %182 : vector<8x32xf32>
    %184 = arith.mulf %180, %147 : vector<8x32xf32>
    %185 = arith.mulf %179, %183 : vector<8x32xf32>
    %186 = arith.addf %184, %185 : vector<8x32xf32>
    %187 = math.tanh %186 : vector<8x32xf32>
    %188 = arith.mulf %181, %187 : vector<8x32xf32>
    %189 = arith.truncf %188 : vector<8x32xf32> to vector<8x32xbf16>
    %cst_35 = arith.constant dense<0.000000e+00> : vector<8x128xf32>
    %190 = tpu.matmul %189, %3, %cst_35 {dimension_numbers = #tpu.dot_dimension_numbers<[1], [0], [0], [1], [0, 0, 1, 1], [], []>} : vector<8x32xbf16>, vector<32x128xbf16>, vector<8x128xf32> -> vector<8x128xf32>
    %191 = arith.addf %190, %9 : vector<8x128xf32>
    %192 = arith.addf %24, %171 : vector<8x128xf32>
    %193 = arith.negf %192 : vector<8x128xf32>
    %194 = math.exp %193 : vector<8x128xf32>
    %cst_36 = arith.constant 1.000000e+00 : f32
    %195 = vector.broadcast %cst_36 : f32 to vector<8x128xf32>
    %196 = arith.addf %195, %194 : vector<8x128xf32>
    %197 = arith.divf %195, %196 : vector<8x128xf32>
    %198 = vector.extract_strided_slice %197 {offsets = [0, 0], sizes = [8, 32], strides = [1, 1]} : vector<8x128xf32> to vector<8x32xf32>
    %199 = vector.extract_strided_slice %197 {offsets = [0, 32], sizes = [8, 32], strides = [1, 1]} : vector<8x128xf32> to vector<8x32xf32>
    %200 = vector.extract_strided_slice %197 {offsets = [0, 96], sizes = [8, 32], strides = [1, 1]} : vector<8x128xf32> to vector<8x32xf32>
    %201 = vector.extract_strided_slice %192 {offsets = [0, 64], sizes = [8, 32], strides = [1, 1]} : vector<8x128xf32> to vector<8x32xf32>
    %202 = math.tanh %201 : vector<8x32xf32>
    %203 = arith.mulf %199, %166 : vector<8x32xf32>
    %204 = arith.mulf %198, %202 : vector<8x32xf32>
    %205 = arith.addf %203, %204 : vector<8x32xf32>
    %206 = math.tanh %205 : vector<8x32xf32>
    %207 = arith.mulf %200, %206 : vector<8x32xf32>
    %208 = arith.truncf %207 : vector<8x32xf32> to vector<8x32xbf16>
    %cst_37 = arith.constant dense<0.000000e+00> : vector<8x256xf32>
    %209 = tpu.matmul %208, %2, %cst_37 {dimension_numbers = #tpu.dot_dimension_numbers<[1], [0], [0], [1], [0, 0, 1, 1], [], []>} : vector<8x32xbf16>, vector<32x256xbf16>, vector<8x256xf32> -> vector<8x256xf32>
    %210 = vector.extract_strided_slice %209 {offsets = [0, 0], sizes = [8, 128], strides = [1, 1]} : vector<8x256xf32> to vector<8x128xf32>
    %211 = vector.extract_strided_slice %209 {offsets = [0, 128], sizes = [8, 128], strides = [1, 1]} : vector<8x256xf32> to vector<8x128xf32>
    %212 = arith.addf %211, %191 : vector<8x128xf32>
    %213 = arith.negf %212 : vector<8x128xf32>
    %214 = math.exp %213 : vector<8x128xf32>
    %cst_38 = arith.constant 1.000000e+00 : f32
    %215 = vector.broadcast %cst_38 : f32 to vector<8x128xf32>
    %216 = arith.addf %215, %214 : vector<8x128xf32>
    %217 = arith.divf %215, %216 : vector<8x128xf32>
    %218 = vector.extract_strided_slice %217 {offsets = [0, 0], sizes = [8, 32], strides = [1, 1]} : vector<8x128xf32> to vector<8x32xf32>
    %219 = vector.extract_strided_slice %217 {offsets = [0, 32], sizes = [8, 32], strides = [1, 1]} : vector<8x128xf32> to vector<8x32xf32>
    %220 = vector.extract_strided_slice %217 {offsets = [0, 96], sizes = [8, 32], strides = [1, 1]} : vector<8x128xf32> to vector<8x32xf32>
    %221 = vector.extract_strided_slice %212 {offsets = [0, 64], sizes = [8, 32], strides = [1, 1]} : vector<8x128xf32> to vector<8x32xf32>
    %222 = math.tanh %221 : vector<8x32xf32>
    %223 = arith.mulf %219, %186 : vector<8x32xf32>
    %224 = arith.mulf %218, %222 : vector<8x32xf32>
    %225 = arith.addf %223, %224 : vector<8x32xf32>
    %226 = math.tanh %225 : vector<8x32xf32>
    %227 = arith.mulf %220, %226 : vector<8x32xf32>
    %228 = arith.truncf %227 : vector<8x32xf32> to vector<8x32xbf16>
    %cst_39 = arith.constant dense<0.000000e+00> : vector<8x128xf32>
    %229 = tpu.matmul %228, %3, %cst_39 {dimension_numbers = #tpu.dot_dimension_numbers<[1], [0], [0], [1], [0, 0, 1, 1], [], []>} : vector<8x32xbf16>, vector<32x128xbf16>, vector<8x128xf32> -> vector<8x128xf32>
    %230 = arith.addf %229, %9 : vector<8x128xf32>
    %231 = arith.addf %27, %210 : vector<8x128xf32>
    %232 = arith.negf %231 : vector<8x128xf32>
    %233 = math.exp %232 : vector<8x128xf32>
    %cst_40 = arith.constant 1.000000e+00 : f32
    %234 = vector.broadcast %cst_40 : f32 to vector<8x128xf32>
    %235 = arith.addf %234, %233 : vector<8x128xf32>
    %236 = arith.divf %234, %235 : vector<8x128xf32>
    %237 = vector.extract_strided_slice %236 {offsets = [0, 0], sizes = [8, 32], strides = [1, 1]} : vector<8x128xf32> to vector<8x32xf32>
    %238 = vector.extract_strided_slice %236 {offsets = [0, 32], sizes = [8, 32], strides = [1, 1]} : vector<8x128xf32> to vector<8x32xf32>
    %239 = vector.extract_strided_slice %236 {offsets = [0, 96], sizes = [8, 32], strides = [1, 1]} : vector<8x128xf32> to vector<8x32xf32>
    %240 = vector.extract_strided_slice %231 {offsets = [0, 64], sizes = [8, 32], strides = [1, 1]} : vector<8x128xf32> to vector<8x32xf32>
    %241 = math.tanh %240 : vector<8x32xf32>
    %242 = arith.mulf %238, %205 : vector<8x32xf32>
    %243 = arith.mulf %237, %241 : vector<8x32xf32>
    %244 = arith.addf %242, %243 : vector<8x32xf32>
    %245 = math.tanh %244 : vector<8x32xf32>
    %246 = arith.mulf %239, %245 : vector<8x32xf32>
    %247 = arith.truncf %246 : vector<8x32xf32> to vector<8x32xbf16>
    %cst_41 = arith.constant dense<0.000000e+00> : vector<8x256xf32>
    %248 = tpu.matmul %247, %2, %cst_41 {dimension_numbers = #tpu.dot_dimension_numbers<[1], [0], [0], [1], [0, 0, 1, 1], [], []>} : vector<8x32xbf16>, vector<32x256xbf16>, vector<8x256xf32> -> vector<8x256xf32>
    %249 = vector.extract_strided_slice %248 {offsets = [0, 0], sizes = [8, 128], strides = [1, 1]} : vector<8x256xf32> to vector<8x128xf32>
    %250 = vector.extract_strided_slice %248 {offsets = [0, 128], sizes = [8, 128], strides = [1, 1]} : vector<8x256xf32> to vector<8x128xf32>
    %251 = arith.addf %250, %230 : vector<8x128xf32>
    %252 = arith.negf %251 : vector<8x128xf32>
    %253 = math.exp %252 : vector<8x128xf32>
    %cst_42 = arith.constant 1.000000e+00 : f32
    %254 = vector.broadcast %cst_42 : f32 to vector<8x128xf32>
    %255 = arith.addf %254, %253 : vector<8x128xf32>
    %256 = arith.divf %254, %255 : vector<8x128xf32>
    %257 = vector.extract_strided_slice %256 {offsets = [0, 0], sizes = [8, 32], strides = [1, 1]} : vector<8x128xf32> to vector<8x32xf32>
    %258 = vector.extract_strided_slice %256 {offsets = [0, 32], sizes = [8, 32], strides = [1, 1]} : vector<8x128xf32> to vector<8x32xf32>
    %259 = vector.extract_strided_slice %256 {offsets = [0, 96], sizes = [8, 32], strides = [1, 1]} : vector<8x128xf32> to vector<8x32xf32>
    %260 = vector.extract_strided_slice %251 {offsets = [0, 64], sizes = [8, 32], strides = [1, 1]} : vector<8x128xf32> to vector<8x32xf32>
    %261 = math.tanh %260 : vector<8x32xf32>
    %262 = arith.mulf %258, %225 : vector<8x32xf32>
    %263 = arith.mulf %257, %261 : vector<8x32xf32>
    %264 = arith.addf %262, %263 : vector<8x32xf32>
    %265 = math.tanh %264 : vector<8x32xf32>
    %266 = arith.mulf %259, %265 : vector<8x32xf32>
    %267 = arith.truncf %266 : vector<8x32xf32> to vector<8x32xbf16>
    %cst_43 = arith.constant dense<0.000000e+00> : vector<8x128xf32>
    %268 = tpu.matmul %267, %3, %cst_43 {dimension_numbers = #tpu.dot_dimension_numbers<[1], [0], [0], [1], [0, 0, 1, 1], [], []>} : vector<8x32xbf16>, vector<32x128xbf16>, vector<8x128xf32> -> vector<8x128xf32>
    %269 = arith.addf %268, %9 : vector<8x128xf32>
    %270 = arith.addf %30, %249 : vector<8x128xf32>
    %271 = arith.negf %270 : vector<8x128xf32>
    %272 = math.exp %271 : vector<8x128xf32>
    %cst_44 = arith.constant 1.000000e+00 : f32
    %273 = vector.broadcast %cst_44 : f32 to vector<8x128xf32>
    %274 = arith.addf %273, %272 : vector<8x128xf32>
    %275 = arith.divf %273, %274 : vector<8x128xf32>
    %276 = vector.extract_strided_slice %275 {offsets = [0, 0], sizes = [8, 32], strides = [1, 1]} : vector<8x128xf32> to vector<8x32xf32>
    %277 = vector.extract_strided_slice %275 {offsets = [0, 32], sizes = [8, 32], strides = [1, 1]} : vector<8x128xf32> to vector<8x32xf32>
    %278 = vector.extract_strided_slice %275 {offsets = [0, 96], sizes = [8, 32], strides = [1, 1]} : vector<8x128xf32> to vector<8x32xf32>
    %279 = vector.extract_strided_slice %270 {offsets = [0, 64], sizes = [8, 32], strides = [1, 1]} : vector<8x128xf32> to vector<8x32xf32>
    %280 = math.tanh %279 : vector<8x32xf32>
    %281 = arith.mulf %277, %244 : vector<8x32xf32>
    %282 = arith.mulf %276, %280 : vector<8x32xf32>
    %283 = arith.addf %281, %282 : vector<8x32xf32>
    %284 = math.tanh %283 : vector<8x32xf32>
    %285 = arith.mulf %278, %284 : vector<8x32xf32>
    %286 = arith.truncf %285 : vector<8x32xf32> to vector<8x32xbf16>
    %cst_45 = arith.constant dense<0.000000e+00> : vector<8x256xf32>
    %287 = tpu.matmul %286, %2, %cst_45 {dimension_numbers = #tpu.dot_dimension_numbers<[1], [0], [0], [1], [0, 0, 1, 1], [], []>} : vector<8x32xbf16>, vector<32x256xbf16>, vector<8x256xf32> -> vector<8x256xf32>
    %288 = vector.extract_strided_slice %287 {offsets = [0, 0], sizes = [8, 128], strides = [1, 1]} : vector<8x256xf32> to vector<8x128xf32>
    %289 = vector.extract_strided_slice %287 {offsets = [0, 128], sizes = [8, 128], strides = [1, 1]} : vector<8x256xf32> to vector<8x128xf32>
    %290 = arith.addf %289, %269 : vector<8x128xf32>
    %291 = arith.negf %290 : vector<8x128xf32>
    %292 = math.exp %291 : vector<8x128xf32>
    %cst_46 = arith.constant 1.000000e+00 : f32
    %293 = vector.broadcast %cst_46 : f32 to vector<8x128xf32>
    %294 = arith.addf %293, %292 : vector<8x128xf32>
    %295 = arith.divf %293, %294 : vector<8x128xf32>
    %296 = vector.extract_strided_slice %295 {offsets = [0, 0], sizes = [8, 32], strides = [1, 1]} : vector<8x128xf32> to vector<8x32xf32>
    %297 = vector.extract_strided_slice %295 {offsets = [0, 32], sizes = [8, 32], strides = [1, 1]} : vector<8x128xf32> to vector<8x32xf32>
    %298 = vector.extract_strided_slice %295 {offsets = [0, 96], sizes = [8, 32], strides = [1, 1]} : vector<8x128xf32> to vector<8x32xf32>
    %299 = vector.extract_strided_slice %290 {offsets = [0, 64], sizes = [8, 32], strides = [1, 1]} : vector<8x128xf32> to vector<8x32xf32>
    %300 = math.tanh %299 : vector<8x32xf32>
    %301 = arith.mulf %297, %264 : vector<8x32xf32>
    %302 = arith.mulf %296, %300 : vector<8x32xf32>
    %303 = arith.addf %301, %302 : vector<8x32xf32>
    %304 = math.tanh %303 : vector<8x32xf32>
    %305 = arith.mulf %298, %304 : vector<8x32xf32>
    %306 = arith.truncf %305 : vector<8x32xf32> to vector<8x32xbf16>
    %cst_47 = arith.constant dense<0.000000e+00> : vector<8x128xf32>
    %307 = tpu.matmul %306, %3, %cst_47 {dimension_numbers = #tpu.dot_dimension_numbers<[1], [0], [0], [1], [0, 0, 1, 1], [], []>} : vector<8x32xbf16>, vector<32x128xbf16>, vector<8x128xf32> -> vector<8x128xf32>
    %308 = arith.addf %307, %9 : vector<8x128xf32>
    %309 = arith.addf %33, %288 : vector<8x128xf32>
    %310 = arith.negf %309 : vector<8x128xf32>
    %311 = math.exp %310 : vector<8x128xf32>
    %cst_48 = arith.constant 1.000000e+00 : f32
    %312 = vector.broadcast %cst_48 : f32 to vector<8x128xf32>
    %313 = arith.addf %312, %311 : vector<8x128xf32>
    %314 = arith.divf %312, %313 : vector<8x128xf32>
    %315 = vector.extract_strided_slice %314 {offsets = [0, 0], sizes = [8, 32], strides = [1, 1]} : vector<8x128xf32> to vector<8x32xf32>
    %316 = vector.extract_strided_slice %314 {offsets = [0, 32], sizes = [8, 32], strides = [1, 1]} : vector<8x128xf32> to vector<8x32xf32>
    %317 = vector.extract_strided_slice %314 {offsets = [0, 96], sizes = [8, 32], strides = [1, 1]} : vector<8x128xf32> to vector<8x32xf32>
    %318 = vector.extract_strided_slice %309 {offsets = [0, 64], sizes = [8, 32], strides = [1, 1]} : vector<8x128xf32> to vector<8x32xf32>
    %319 = math.tanh %318 : vector<8x32xf32>
    %320 = arith.mulf %316, %283 : vector<8x32xf32>
    %321 = arith.mulf %315, %319 : vector<8x32xf32>
    %322 = arith.addf %320, %321 : vector<8x32xf32>
    %323 = math.tanh %322 : vector<8x32xf32>
    %324 = arith.mulf %317, %323 : vector<8x32xf32>
    %325 = arith.truncf %324 : vector<8x32xf32> to vector<8x32xbf16>
    %cst_49 = arith.constant dense<0.000000e+00> : vector<8x256xf32>
    %326 = tpu.matmul %325, %2, %cst_49 {dimension_numbers = #tpu.dot_dimension_numbers<[1], [0], [0], [1], [0, 0, 1, 1], [], []>} : vector<8x32xbf16>, vector<32x256xbf16>, vector<8x256xf32> -> vector<8x256xf32>
    %327 = vector.extract_strided_slice %326 {offsets = [0, 128], sizes = [8, 128], strides = [1, 1]} : vector<8x256xf32> to vector<8x128xf32>
    %328 = arith.addf %327, %308 : vector<8x128xf32>
    %329 = arith.negf %328 : vector<8x128xf32>
    %330 = math.exp %329 : vector<8x128xf32>
    %cst_50 = arith.constant 1.000000e+00 : f32
    %331 = vector.broadcast %cst_50 : f32 to vector<8x128xf32>
    %332 = arith.addf %331, %330 : vector<8x128xf32>
    %333 = arith.divf %331, %332 : vector<8x128xf32>
    %334 = vector.extract_strided_slice %333 {offsets = [0, 0], sizes = [8, 32], strides = [1, 1]} : vector<8x128xf32> to vector<8x32xf32>
    %335 = vector.extract_strided_slice %333 {offsets = [0, 32], sizes = [8, 32], strides = [1, 1]} : vector<8x128xf32> to vector<8x32xf32>
    %336 = vector.extract_strided_slice %333 {offsets = [0, 96], sizes = [8, 32], strides = [1, 1]} : vector<8x128xf32> to vector<8x32xf32>
    %337 = vector.extract_strided_slice %328 {offsets = [0, 64], sizes = [8, 32], strides = [1, 1]} : vector<8x128xf32> to vector<8x32xf32>
    %338 = math.tanh %337 : vector<8x32xf32>
    %339 = arith.mulf %335, %303 : vector<8x32xf32>
    %340 = arith.mulf %334, %338 : vector<8x32xf32>
    %341 = arith.addf %339, %340 : vector<8x32xf32>
    %342 = math.tanh %341 : vector<8x32xf32>
    %343 = arith.mulf %336, %342 : vector<8x32xf32>
    %344 = arith.truncf %343 : vector<8x32xf32> to vector<8x32xbf16>
    %c0_51 = arith.constant 0 : index
    %c0_52 = arith.constant 0 : index
    %345 = vector.load %arg6[%c0_51, %c0_52] : memref<32x1xbf16, #tpu.memory_space<vmem>>, vector<32x1xbf16>
    %cst_53 = arith.constant dense<0.000000e+00> : vector<8x1xf32>
    %346 = tpu.matmul %344, %345, %cst_53 {dimension_numbers = #tpu.dot_dimension_numbers<[1], [0], [0], [1], [0, 0, 1, 1], [], []>} : vector<8x32xbf16>, vector<32x1xbf16>, vector<8x1xf32> -> vector<8x1xf32>
    %c0_54 = arith.constant 0 : index
    %c0_55 = arith.constant 0 : index
    %347 = vector.load %arg7[%c0_54, %c0_55] : memref<1x1xf32, #tpu.memory_space<vmem>>, vector<1x1xf32>
    %348 = vector.broadcast %347 : vector<1x1xf32> to vector<8x1xf32>
    %349 = arith.addf %346, %348 : vector<8x1xf32>
    %c0_56 = arith.constant 0 : index
    %c0_57 = arith.constant 0 : index
    %350 = vector.load %arg8[%c0_56, %c0_57] : memref<8x1xf32, #tpu.memory_space<vmem>>, vector<8x1xf32>
    tpu.vector_store %arg8[%c0_56, %c0_57], %349 {strides = array<i32>} : memref<8x1xf32, #tpu.memory_space<vmem>>, vector<8x1xf32>,
    return
  }
}

</mosaic_0001>

<bundles_post_ra>
// kernel: lstm_model_forward.1
= control target key start
LH: loop header
LB: loop body
LE: loop exit
PB: predicated region body
PF: predicated region fallthrough
CT: control target
= control target key end

     0   :  { %vm60_vm0 = vcmask 1041408   ;;  %v2000_v0 = vmov 0.0   ;;  %vm2001_vm1 = vmmov 0   ;;  %vm56_vm2 = vcmask 31744   ;;  %s2003_s10 = smov 32   ;;  %s2004_s11 = smov 112   ;;  %s2422_s1 = inlined_call_operand.vmem [shape: bf16[4,128], index: 1, kind: input, shape index: {}]   ;;  %s2423_s0 = inlined_call_operand.vmem [shape: bf16[8,32], index: 0, kind: input, shape index: {}]   ;;  %s2424_s2 = inlined_call_operand.vmem [shape: f32[1,128], index: 2, kind: input, shape index: {}]   ;;  %s2425_s3 = inlined_call_operand.vmem [shape: bf16[32,256], index: 3, kind: input, shape index: {}]   ;;  %s2426_s5 = inlined_call_operand.vmem [shape: f32[1,128], index: 5, kind: input, shape index: {}]   ;;  %s2427_s4 = inlined_call_operand.vmem [shape: bf16[32,128], index: 4, kind: input, shape index: {}]   ;;  %s2428_s6 = inlined_call_operand.vmem [shape: bf16[32,1], index: 6, kind: input, shape index: {}]   ;;  %s2429_s7 = inlined_call_operand.<no memory space> [shape: f32[1,1], index: 7, kind: input, shape index: {}]   ;;  %s2430_s8 = inlined_call_operand.vmem [shape: f32[8,1], index: 8, kind: output, shape index: {}]  }
   0x1   :  { %1735 = vmatprep.subr.bf16.mxu0 %v2000_v0  ;;  %v33_v1 = vld [vmem:[%s2422_s1] sm:$0x3]  ;;  %1737 = vmatprep.mubr.msk.bf16.mxu0 %vm2001_vm1, %v2000_v0  ;;  %s2005_s12 = smov 124   ;;  %s2006_s13 = smov 120   ;;  %v2112_v28 = vld [vmem:[%s2425_s3 + $0x14] ss:$8 sps:$4 sm:$0xff]  }
   0x2   :  { %v2063_v2 = vsel %vm60_vm0, %v33_v1, 0  ;;  %1741 = vmatprep.subr.bf16.mxu1 %v2000_v0  ;;  %1743 = vmatprep.mubr.msk.bf16.mxu1 %vm2001_vm1, %v2000_v0  ;;  %v32_v3 = vld [vmem:[%s2423_s0] sm:$0xf]  ;;  %s2002_s0 = smov 64   ;;  %s2007_s14 = smov 104   ;;  %v2008_v33 = vmov 0  }
   0x3   :  { %1736 = vmatpush3.bf16.msra.mxu0 %v2063_v2  ;;  %1742 = vmatpush3.bf16.msra.mxu1 %v2063_v2  ;;  %v2083_v4 = vld [vmem:[%s2424_s2] ss:$0 sm:$0xff]  ;;  %v2088_v17 = vcombine.low %v32_v3, %v32_v3  ;;  %v2122_v30 = vld [vmem:[%s2425_s3 + $0x10] ss:$8 sps:$4 sm:$0xff]   ;;  %v2127_v31 = vld [vmem:[%s2425_s3 + $0x4] ss:$8 sps:$4 sm:$0xff]  }
   0x4   :  { %1747 = vmatprep.subr.bf16.mxu0 %v2000_v0  ;;  %1753 = vmatprep.subr.bf16.mxu1 %v2000_v0  ;;  %v2134_v32 = vld [vmem:[%s2425_s3] ss:$8 sps:$4 sm:$0xff]   ;;  %vm471_vm3 = vcmask 261120   ;;  %s2009_s24 = smov 108   ;;  %s2010_s25 = smov 116   ;;  %vm1637_vm4 = vcmask 7168  }
   0x5   :  { %v2156_v53 = vld [vmem:[%s2426_s5] ss:$0 sm:$0xff]  ;;  %s2011_s26 = smov 100  }
   0x6   :  { %1738 = vmatmul.mubr.msk.bf16.vlgmr.msra.gmra.mxu0 %vm56_vm2, %v32_v3 }
   0x7   :  { %1748 = vmatpush3.bf16.msra.mxu0 %v2063_v2  ;;  %1749 = vmatprep.mubr.msk.bf16.mxu0 %vm2001_vm1, %v2000_v0 }
   0x8   :  { %1759 = vmatprep.subr.bf16.mxu0 %v2000_v0 }
  0xc6   :  { %v98_v5 = vpop.f32.mrf.mxu0 }
  0xc7   :  { %v99_v6 = vadd.f32 %v2083_v4, %v98_v5 }
  0xc8   :  { %v1739_v7 = vpop.f32.mrf.mxu0 }
  0xc9   :  { %1870 = vtanh.f32 %v99_v6  ;;  %v1654_v11 = vmul.f32 -1.442695, %v99_v6 }
  0xca   :  { %v101_v8 = vpop.f32.mrf.mxu0 }
  0xcb   :  { %1872 = vpow2.f32 %v1654_v11 }
  0xcc   :  { %v1740_v9 = vpop.f32.mrf.mxu0 }
  0xd6   :  { %v1871_v10 = vpop.eup %1870 }
  0xd7   :  { %432 = vrot.lane.b32.xlu0 %v1871_v10, %s2002_s0 }
  0xd8   :  { %v1873_v12 = vpop.eup %1872 }
  0xd9   :  { %v426_v13 = vadd.f32 1.0, %v1873_v12 }
  0xdb   :  { %1874 = vrcp.f32 %v426_v13 }
  0xe8   :  { %v1875_v14 = vpop.eup %1874 }
  0xe9   :  { %v430_v18 = vmul.f32 0.0, %v1875_v14 }
 0x149   :  { %v433_v15 = vpop.permute.xlu0 %432 }
 0x14a   :  { %v435_v16 = vmul.f32 %v1875_v14, %v433_v15 }
 0x14c   :  { %437 = vrot.lane.b32.xlu0 %v435_v16, %s2003_s10 }
 0x150   :  { %242 = vrot.lane.b32.xlu0 %v2088_v17, %s2004_s11 }
 0x154   :  { %107 = vrot.lane.b32.xlu0 %v2088_v17, %s2005_s12 }
 0x1be   :  { %v438_v19 = vpop.permute.xlu0 %437 }
 0x1bf   :  { %v2092_v20 = vadd.f32 %v438_v19, %v430_v18 }
 0x1c1   :  { %1876 = vtanh.f32 %v2092_v20 }
 0x1c2   :  { %v243_v22 = vpop.permute.xlu0 %242 }
 0x1c6   :  { %v108_v23 = vpop.permute.xlu0 %107 }
 0x1c7   :  { %1744 = vmatmul.mubr.msk.bf16.vlgmr.msra.gmra.mxu1 %vm56_vm2, %v108_v23 }
 0x1c8   :  { %1754 = vmatpush3.bf16.msra.mxu1 %v2063_v2  ;;  %1755 = vmatprep.mubr.msk.bf16.mxu1 %vm2001_vm1, %v2000_v0 }
 0x1c9   :  { %1765 = vmatprep.subr.bf16.mxu1 %v2000_v0 }
 0x1ce   :  { %v1877_v21 = vpop.eup %1876 }
 0x1cf   :  { %443 = vrot.lane.b32.xlu1 %v1877_v21, %s2002_s0 }
 0x1d3   :  { %152 = vrot.lane.b32.xlu1 %v2088_v17, %s2006_s13 }
 0x1d7   :  { %332 = vrot.lane.b32.xlu1 %v2088_v17, %s2007_s14 }
 0x241   :  { %v444_v24 = vpop.permute.xlu1 %443 }
 0x242   :  { %v446_v25 = vmul.f32 %v1875_v14, %v444_v24 }
 0x244   :  { %v447_v26 = vpack.c.bf16 %v446_v25, %v446_v25 }
 0x245   :  { %v153_v27 = vpop.permute.xlu1 %152 }
 0x246   :  { %449 = vrot.lane.b32.xlu1 %v447_v26, %s2003_s10  ;;  %1750 = vmatmul.mubr.msk.bf16.vlgmr.msra.gmra.mxu0 %vm56_vm2, %v153_v27 }
 0x247   :  { %1760 = vmatpush3.bf16.msra.mxu0 %v2063_v2  ;;  %1761 = vmatprep.mubr.msk.bf16.mxu0 %vm2001_vm1, %v2000_v0 }
 0x248   :  { %1771 = vmatprep.subr.bf16.mxu0 %v2000_v0 }
 0x249   :  { %v333_v29 = vpop.permute.xlu1 %332 }
 0x24e   :  { %1762 = vmatmul.mubr.msk.bf16.vlgmr.msra.gmra.mxu0 %vm56_vm2, %v243_v22 }
 0x24f   :  { %1772 = vmatpush3.bf16.msra.mxu0 %v2063_v2  ;;  %1773 = vmatprep.mubr.msk.bf16.mxu0 %vm2001_vm1, %v2000_v0 }
 0x250   :  { %487 = vmatprep.subr.bf16.mxu0 %v2112_v28 }
 0x256   :  { %1774 = vmatmul.mubr.msk.bf16.vlgmr.msra.gmra.mxu0 %vm56_vm2, %v333_v29 }
 0x257   :  { %488 = vmatpush1.bf16.msra.mxu0 %v2122_v30  ;;  %507 = vmatprep.mubr.bf16.mxu0 %v2008_v33 }
 0x258   :  { %489 = vmatprep.subr.bf16.mxu0 %v2127_v31 }
 0x25b   :  { %490 = vmatpush1.bf16.msra.mxu0 %v2134_v32 }
 0x25c   :  { %644 = vmatprep.subr.bf16.mxu0 %v2112_v28 }
 0x287   :  { %v146_v34 = vpop.f32.mrf.mxu1 }
 0x288   :  { %v147_v51 = vadd.f32 %v2083_v4, %v146_v34  ;;  %v2190_v34 = vld [vmem:[%s2427_s4 + $0x8] sm:$0xff]  }
 0x289   :  { %v1745_v35 = vpop.f32.mrf.mxu1 }
 0x28a   :  { %v2197_v35 = vld [vmem:[%s2427_s4] sm:$0xff]  }
 0x28b   :  { %v149_v36 = vpop.f32.mrf.mxu1 }
 0x28d   :  { %v1746_v37 = vpop.f32.mrf.mxu1 }
 0x2b8   :  { %v450_v38 = vpop.permute.xlu1 %449 }
 0x2b9   :  { %1659 = vmatmul.mubr.msk.bf16.vlgmr.msra.gmra.mxu0 %vm471_vm3, %v450_v38 }
 0x2ba   :  { %645 = vmatpush1.bf16.msra.mxu0 %v2122_v30  ;;  %664 = vmatprep.mubr.bf16.mxu0 %v2008_v33 }
 0x2bb   :  { %646 = vmatprep.subr.bf16.mxu0 %v2127_v31 }
 0x2be   :  { %647 = vmatpush1.bf16.msra.mxu0 %v2134_v32 }
 0x2bf   :  { %789 = vmatprep.subr.bf16.mxu0 %v2112_v28 }
 0x306   :  { %v2146_v39 = vpop.f32.mrf.mxu0 }
 0x308   :  { %v1751_v40 = vpop.f32.mrf.mxu0 }
 0x30a   :  { %v194_v41 = vpop.f32.mrf.mxu0 }
 0x30c   :  { %v1752_v42 = vpop.f32.mrf.mxu0 }
 0x30e   :  { %v2148_v43 = vpop.f32.mrf.mxu0 }
 0x310   :  { %v1763_v44 = vpop.f32.mrf.mxu0 }
 0x312   :  { %v284_v45 = vpop.f32.mrf.mxu0 }
 0x314   :  { %v1764_v46 = vpop.f32.mrf.mxu0 }
 0x316   :  { %v2150_v47 = vpop.f32.mrf.mxu0 }
 0x318   :  { %v1775_v48 = vpop.f32.mrf.mxu0 }
 0x31a   :  { %v374_v49 = vpop.f32.mrf.mxu0 }
 0x31c   :  { %v1776_v50 = vpop.f32.mrf.mxu0 }
 0x379   :  { %v509_v52 = vpop.f32.mrf.mxu0 }
 0x37a   :  { %v600_v54 = vadd.f32 %v509_v52, %v147_v51  ;;  %v192_v52 = vadd.f32 %v2083_v4, %v2146_v39 }
 0x37b   :  { %v511_v55 = vpop.f32.mrf.mxu0 }
 0x37c   :  { %1878 = vtanh.f32 %v600_v54  ;;  %v516_v56 = vadd.f32 %v2156_v53, %v511_v55  ;;  %v1664_v61 = vmul.f32 -1.442695, %v600_v54 }
 0x37d   :  { %v513_v57 = vpop.f32.mrf.mxu0 }
 0x37e   :  { %1880 = vtanh.f32 %v516_v56  ;;  %v1660_v62 = vmul.f32 -1.442695, %v516_v56 }
 0x37f   :  { %v514_v58 = vpop.f32.mrf.mxu0  ;;  %1882 = vpow2.f32 %v1664_v61 }
 0x380   :  { %1884 = vpow2.f32 %v1660_v62 }
 0x389   :  { %v1879_v59 = vpop.eup %1878 }
 0x38a   :  { %610 = vrot.lane.b32.xlu1 %v1879_v59, %s2002_s0 }
 0x38b   :  { %v1881_v60 = vpop.eup %1880 }
 0x38c   :  { %526 = vrot.lane.b32.xlu0 %v1881_v60, %s2002_s0  ;;  %v1883_v63 = vpop.eup %1882 }
 0x38d   :  { %v1885_v1 = vpop.eup %1884  ;;  %v604_v3 = vadd.f32 1.0, %v1883_v63 }
 0x38e   :  { %v520_v5 = vadd.f32 1.0, %v1885_v1 }
 0x38f   :  { %1886 = vrcp.f32 %v604_v3 }
 0x390   :  { %1888 = vrcp.f32 %v520_v5 }
 0x39c   :  { %v1887_v6 = vpop.eup %1886 }
 0x39d   :  { %v1889_v9 = vpop.eup %1888  ;;  %v608_v12 = vmul.f32 %v1887_v6, %v2092_v20 }
 0x39e   :  { %v524_v15 = vmul.f32 0.0, %v1889_v9 }
 0x3fc   :  { %v611_v7 = vpop.permute.xlu1 %610 }
 0x3fd   :  { %v613_v8 = vmul.f32 %v1887_v6, %v611_v7 }
 0x3fe   :  { %v527_v10 = vpop.permute.xlu0 %526 }
 0x3ff   :  { %615 = vrot.lane.b32.xlu1 %v613_v8, %s2003_s10  ;;  %v529_v11 = vmul.f32 %v1889_v9, %v527_v10 }
 0x401   :  { %531 = vrot.lane.b32.xlu0 %v529_v11, %s2003_s10 }
 0x471   :  { %v616_v13 = vpop.permute.xlu1 %615 }
 0x472   :  { %v2164_v14 = vadd.f32 %v616_v13, %v608_v12 }
 0x473   :  { %v532_v16 = vpop.permute.xlu0 %531 }
 0x474   :  { %1890 = vtanh.f32 %v2164_v14  ;;  %v2167_v18 = vadd.f32 %v532_v16, %v524_v15 }
 0x476   :  { %1892 = vtanh.f32 %v2167_v18 }
 0x481   :  { %v1891_v19 = vpop.eup %1890 }
 0x482   :  { %621 = vrot.lane.b32.xlu1 %v1891_v19, %s2002_s0 }
 0x483   :  { %v1893_v21 = vpop.eup %1892 }
 0x484   :  { %537 = vrot.lane.b32.xlu0 %v1893_v21, %s2002_s0 }
 0x486   :  { %287 = vrot.lane.b32.xlu1 %v2088_v17, %s2009_s24 }
 0x488   :  { %197 = vrot.lane.b32.xlu0 %v2088_v17, %s2010_s25 }
 0x48c   :  { %377 = vrot.lane.b32.xlu0 %v2088_v17, %s2011_s26 }
 0x4f4   :  { %v622_v20 = vpop.permute.xlu1 %621 }
 0x4f5   :  { %v624_v22 = vmul.f32 %v1887_v6, %v622_v20 }
 0x4f6   :  { %v538_v24 = vpop.permute.xlu0 %537 }
 0x4f7   :  { %v625_v23 = vpack.c.bf16 %v624_v22, %v624_v22  ;;  %v540_v25 = vmul.f32 %v1889_v9, %v538_v24 }
 0x4f8   :  { %v288_v17 = vpop.permute.xlu1 %287 }
 0x4f9   :  { %627 = vrot.lane.b32.xlu0 %v625_v23, %s2003_s10  ;;  %v541_v26 = vpack.c.bf16 %v540_v25, %v540_v25 }
 0x4fa   :  { %v198_v27 = vpop.permute.xlu0 %197 }
 0x4fb   :  { %543 = vrot.lane.b32.xlu1 %v541_v26, %s2003_s10  ;;  %1756 = vmatmul.mubr.msk.bf16.vlgmr.msra.gmra.mxu1 %vm56_vm2, %v198_v27 }
 0x4fc   :  { %1766 = vmatpush3.bf16.msra.mxu1 %v2063_v2  ;;  %1767 = vmatprep.mubr.msk.bf16.mxu1 %vm2001_vm1, %v2000_v0 }
 0x4fd   :  { %1777 = vmatprep.subr.bf16.mxu1 %v2000_v0 }
 0x4fe   :  { %v378_v29 = vpop.permute.xlu0 %377 }
 0x503   :  { %1768 = vmatmul.mubr.msk.bf16.vlgmr.msra.gmra.mxu1 %vm56_vm2, %v288_v17 }
 0x504   :  { %1778 = vmatpush3.bf16.msra.mxu1 %v2063_v2  ;;  %1779 = vmatprep.mubr.msk.bf16.mxu1 %vm2001_vm1, %v2000_v0 }
 0x505   :  { %1783 = vmatprep.subr.bf16.mxu1 %v2000_v0 }
 0x50b   :  { %1780 = vmatmul.mubr.msk.bf16.vlgmr.msra.gmra.mxu1 %vm56_vm2, %v378_v29 }
 0x50c   :  { %1784 = vmatpush3.bf16.msra.mxu1 %v2190_v34  ;;  %1787 = vmatprep.mubr.msk.bf16.mxu1 %vm2001_vm1, %v2000_v0 }
 0x50d   :  { %1785 = vmatprep.subr.bf16.mxu1 %v2000_v0 }
 0x510   :  { %1786 = vmatpush3.bf16.msra.mxu1 %v2197_v35 }
 0x511   :  { %1791 = vmatprep.subr.bf16.mxu1 %v2000_v0 }
 0x56b   :  { %v628_v2 = vpop.permute.xlu0 %627 }
 0x56c   :  { %1665 = vmatmul.mubr.msk.bf16.vlgmr.msra.gmra.mxu0 %vm471_vm3, %v628_v2 }
 0x56d   :  { %790 = vmatpush1.bf16.msra.mxu0 %v2122_v30  ;;  %809 = vmatprep.mubr.bf16.mxu0 %v2008_v33  ;;  %v544_v36 = vpop.permute.xlu1 %543 }
 0x56e   :  { %791 = vmatprep.subr.bf16.mxu0 %v2127_v31  ;;  %1788 = vmatmul.mubr.msk.bf16.vlgmr.msra.gmra.mxu1 %vm471_vm3, %v544_v36 }
 0x56f   :  { %1792 = vmatpush3.bf16.msra.mxu1 %v2190_v34  ;;  %1795 = vmatprep.mubr.msk.bf16.mxu1 %vm2001_vm1, %v2000_v0 }
 0x570   :  { %1793 = vmatprep.subr.bf16.mxu1 %v2000_v0 }
 0x571   :  { %792 = vmatpush1.bf16.msra.mxu0 %v2134_v32 }
 0x572   :  { %934 = vmatprep.subr.bf16.mxu0 %v2112_v28 }
 0x573   :  { %1794 = vmatpush3.bf16.msra.mxu1 %v2197_v35 }
 0x574   :  { %1799 = vmatprep.subr.bf16.mxu1 %v2000_v0 }
 0x5bb   :  { %v2217_v37 = vpop.f32.mrf.mxu1 }
 0x5bd   :  { %v1757_v38 = vpop.f32.mrf.mxu1 }
 0x5bf   :  { %v239_v40 = vpop.f32.mrf.mxu1 }
 0x5c1   :  { %v1758_v41 = vpop.f32.mrf.mxu1 }
 0x5c2   :  { %v237_v41 = vadd.f32 %v2083_v4, %v2217_v37 }
 0x5c3   :  { %v2219_v42 = vpop.f32.mrf.mxu1 }
 0x5c5   :  { %v1769_v44 = vpop.f32.mrf.mxu1 }
 0x5c7   :  { %v329_v45 = vpop.f32.mrf.mxu1 }
 0x5c9   :  { %v1770_v46 = vpop.f32.mrf.mxu1 }
 0x5cb   :  { %v2221_v48 = vpop.f32.mrf.mxu1 }
 0x5cd   :  { %v1781_v49 = vpop.f32.mrf.mxu1 }
 0x5cf   :  { %v419_v50 = vpop.f32.mrf.mxu1 }
 0x5d1   :  { %v1782_v51 = vpop.f32.mrf.mxu1 }
 0x62c   :  { %v666_v54 = vpop.f32.mrf.mxu0 }
 0x62d   :  { %v745_v55 = vadd.f32 %v666_v54, %v192_v52 }
 0x62e   :  { %v668_v56 = vpop.f32.mrf.mxu0  ;;  %v594_v57 = vpop.f32.mrf.mxu1 }
 0x62f   :  { %1894 = vtanh.f32 %v745_v55  ;;  %v595_v58 = vadd.f32 %v2156_v53, %v594_v57  ;;  %v1668_v39 = vmul.f32 -1.442695, %v745_v55 }
 0x630   :  { %v670_v59 = vpop.f32.mrf.mxu0  ;;  %v1789_v60 = vpop.f32.mrf.mxu1 }
 0x631   :  { %v673_v61 = vadd.f32 %v668_v56, %v595_v58 }
 0x632   :  { %v671_v62 = vpop.f32.mrf.mxu0  ;;  %v597_v63 = vpop.f32.mrf.mxu1 }
 0x633   :  { %1896 = vtanh.f32 %v673_v61  ;;  %v1666_v6 = vmul.f32 -1.442695, %v673_v61 }
 0x634   :  { %v1790_v1 = vpop.f32.mrf.mxu1  ;;  %1898 = vpow2.f32 %v1668_v39 }
 0x635   :  { %1900 = vpow2.f32 %v1666_v6 }
 0x63c   :  { %v1895_v3 = vpop.eup %1894 }
 0x63d   :  { %755 = vrot.lane.b32.xlu0 %v1895_v3, %s2002_s0 }
 0x640   :  { %v1897_v5 = vpop.eup %1896 }
 0x641   :  { %683 = vrot.lane.b32.xlu1 %v1897_v5, %s2002_s0  ;;  %v1899_v7 = vpop.eup %1898 }
 0x642   :  { %v749_v8 = vadd.f32 1.0, %v1899_v7  ;;  %v1901_v9 = vpop.eup %1900 }
 0x643   :  { %v677_v10 = vadd.f32 1.0, %v1901_v9 }
 0x644   :  { %1902 = vrcp.f32 %v749_v8 }
 0x645   :  { %1904 = vrcp.f32 %v677_v10 }
 0x651   :  { %v1903_v11 = vpop.eup %1902 }
 0x652   :  { %v1905_v15 = vpop.eup %1904  ;;  %v753_v21 = vmul.f32 %v1903_v11, %v2164_v14 }
 0x653   :  { %v681_v23 = vmul.f32 %v1905_v15, %v2167_v18 }
 0x6af   :  { %v756_v12 = vpop.permute.xlu0 %755 }
 0x6b0   :  { %v758_v13 = vmul.f32 %v1903_v11, %v756_v12 }
 0x6b2   :  { %760 = vrot.lane.b32.xlu0 %v758_v13, %s2003_s10 }
 0x6b3   :  { %v684_v16 = vpop.permute.xlu1 %683 }
 0x6b4   :  { %v686_v19 = vmul.f32 %v1905_v15, %v684_v16 }
 0x6b6   :  { %688 = vrot.lane.b32.xlu1 %v686_v19, %s2003_s10 }
 0x724   :  { %v761_v20 = vpop.permute.xlu0 %760 }
 0x725   :  { %v2231_v22 = vadd.f32 %v761_v20, %v753_v21 }
 0x727   :  { %1906 = vtanh.f32 %v2231_v22 }
 0x728   :  { %v689_v24 = vpop.permute.xlu1 %688 }
 0x729   :  { %v2235_v25 = vadd.f32 %v689_v24, %v681_v23 }
 0x72b   :  { %1908 = vtanh.f32 %v2235_v25 }
 0x734   :  { %v1907_v26 = vpop.eup %1906 }
 0x735   :  { %766 = vrot.lane.b32.xlu0 %v1907_v26, %s2002_s0 }
 0x738   :  { %v1909_v27 = vpop.eup %1908 }
 0x739   :  { %694 = vrot.lane.b32.xlu1 %v1909_v27, %s2002_s0 }
 0x7a7   :  { %v767_v17 = vpop.permute.xlu0 %766 }
 0x7a8   :  { %v769_v14 = vmul.f32 %v1903_v11, %v767_v17  ;;  %v282_v17 = vadd.f32 %v2083_v4, %v2148_v43 }
 0x7aa   :  { %v770_v29 = vpack.c.bf16 %v769_v14, %v769_v14 }
 0x7ab   :  { %v695_v2 = vpop.permute.xlu1 %694 }
 0x7ac   :  { %772 = vrot.lane.b32.xlu0 %v770_v29, %s2003_s10  ;;  %v697_v36 = vmul.f32 %v1905_v15, %v695_v2 }
 0x7ae   :  { %v698_v38 = vpack.c.bf16 %v697_v36, %v697_v36 }
 0x7b0   :  { %700 = vrot.lane.b32.xlu1 %v698_v38, %s2003_s10 }
 0x81e   :  { %v773_v18 = vpop.permute.xlu0 %772 }
 0x81f   :  { %1669 = vmatmul.mubr.msk.bf16.vlgmr.msra.gmra.mxu0 %vm471_vm3, %v773_v18 }
 0x820   :  { %935 = vmatpush1.bf16.msra.mxu0 %v2122_v30  ;;  %954 = vmatprep.mubr.bf16.mxu0 %v2008_v33 }
 0x821   :  { %936 = vmatprep.subr.bf16.mxu0 %v2127_v31 }
 0x822   :  { %v701_v40 = vpop.permute.xlu1 %700 }
 0x823   :  { %1796 = vmatmul.mubr.msk.bf16.vlgmr.msra.gmra.mxu1 %vm471_vm3, %v701_v40 }
 0x824   :  { %937 = vmatpush1.bf16.msra.mxu0 %v2134_v32  ;;  %1800 = vmatpush3.bf16.msra.mxu1 %v2190_v34 }
 0x825   :  { %1803 = vmatprep.mubr.msk.bf16.mxu1 %vm2001_vm1, %v2000_v0  ;;  %1801 = vmatprep.subr.bf16.mxu1 %v2000_v0 }
 0x826   :  { %1079 = vmatprep.subr.bf16.mxu0 %v2112_v28 }
 0x828   :  { %1802 = vmatpush3.bf16.msra.mxu1 %v2197_v35 }
 0x829   :  { %1807 = vmatprep.subr.bf16.mxu1 %v2000_v0 }
 0x8df   :  { %v811_v44 = vpop.f32.mrf.mxu0 }
 0x8e0   :  { %v890_v45 = vadd.f32 %v811_v44, %v237_v41 }
 0x8e1   :  { %v813_v46 = vpop.f32.mrf.mxu0 }
 0x8e2   :  { %1910 = vtanh.f32 %v890_v45  ;;  %v1672_v37 = vmul.f32 -1.442695, %v890_v45 }
 0x8e3   :  { %v815_v49 = vpop.f32.mrf.mxu0  ;;  %v739_v50 = vpop.f32.mrf.mxu1 }
 0x8e4   :  { %v740_v51 = vadd.f32 %v2156_v53, %v739_v50 }
 0x8e5   :  { %v816_v52 = vpop.f32.mrf.mxu0  ;;  %v1797_v54 = vpop.f32.mrf.mxu1 }
 0x8e6   :  { %v818_v55 = vadd.f32 %v813_v46, %v740_v51 }
 0x8e7   :  { %v742_v56 = vpop.f32.mrf.mxu1 }
 0x8e8   :  { %1912 = vtanh.f32 %v818_v55  ;;  %v1670_v60 = vmul.f32 -1.442695, %v818_v55 }
 0x8e9   :  { %v1798_v57 = vpop.f32.mrf.mxu1  ;;  %1914 = vpow2.f32 %v1672_v37 }
 0x8ea   :  { %1916 = vpow2.f32 %v1670_v60 }
 0x8ef   :  { %v1911_v58 = vpop.eup %1910 }
 0x8f0   :  { %900 = vrot.lane.b32.xlu0 %v1911_v58, %s2002_s0 }
 0x8f5   :  { %v1913_v59 = vpop.eup %1912 }
 0x8f6   :  { %828 = vrot.lane.b32.xlu1 %v1913_v59, %s2002_s0  ;;  %v1915_v61 = vpop.eup %1914 }
 0x8f7   :  { %v894_v62 = vadd.f32 1.0, %v1915_v61  ;;  %v1917_v63 = vpop.eup %1916 }
 0x8f8   :  { %v822_v1 = vadd.f32 1.0, %v1917_v63 }
 0x8f9   :  { %1918 = vrcp.f32 %v894_v62 }
 0x8fa   :  { %1920 = vrcp.f32 %v822_v1 }
 0x906   :  { %v1919_v3 = vpop.eup %1918 }
 0x907   :  { %v1921_v6 = vpop.eup %1920  ;;  %v898_v9 = vmul.f32 %v1919_v3, %v2231_v22 }
 0x908   :  { %v826_v12 = vmul.f32 %v1921_v6, %v2235_v25 }
 0x962   :  { %v901_v5 = vpop.permute.xlu0 %900 }
 0x963   :  { %v903_v39 = vmul.f32 %v1919_v3, %v901_v5 }
 0x965   :  { %905 = vrot.lane.b32.xlu0 %v903_v39, %s2003_s10 }
 0x968   :  { %v829_v7 = vpop.permute.xlu1 %828 }
 0x969   :  { %v831_v8 = vmul.f32 %v1921_v6, %v829_v7 }
 0x96b   :  { %833 = vrot.lane.b32.xlu1 %v831_v8, %s2003_s10 }
 0x9d7   :  { %v906_v10 = vpop.permute.xlu0 %905 }
 0x9d8   :  { %v2263_v11 = vadd.f32 %v906_v10, %v898_v9 }
 0x9da   :  { %1922 = vtanh.f32 %v2263_v11 }
 0x9dd   :  { %v834_v13 = vpop.permute.xlu1 %833 }
 0x9de   :  { %v2267_v15 = vadd.f32 %v834_v13, %v826_v12 }
 0x9e0   :  { %1924 = vtanh.f32 %v2267_v15 }
 0x9e7   :  { %v1923_v16 = vpop.eup %1922 }
 0x9e8   :  { %911 = vrot.lane.b32.xlu0 %v1923_v16, %s2002_s0 }
 0x9ed   :  { %v1925_v19 = vpop.eup %1924 }
 0x9ee   :  { %839 = vrot.lane.b32.xlu1 %v1925_v19, %s2002_s0  ;;  %v327_v19 = vadd.f32 %v2083_v4, %v2219_v42 }
 0xa5a   :  { %v912_v21 = vpop.permute.xlu0 %911 }
 0xa5b   :  { %v914_v20 = vmul.f32 %v1919_v3, %v912_v21 }
 0xa5d   :  { %v915_v22 = vpack.c.bf16 %v914_v20, %v914_v20 }
 0xa5f   :  { %917 = vrot.lane.b32.xlu0 %v915_v22, %s2003_s10 }
 0xa60   :  { %v840_v23 = vpop.permute.xlu1 %839 }
 0xa61   :  { %v842_v24 = vmul.f32 %v1921_v6, %v840_v23 }
 0xa63   :  { %v843_v26 = vpack.c.bf16 %v842_v24, %v842_v24 }
 0xa65   :  { %845 = vrot.lane.b32.xlu1 %v843_v26, %s2003_s10 }
 0xad1   :  { %v918_v25 = vpop.permute.xlu0 %917 }
 0xad2   :  { %1673 = vmatmul.mubr.msk.bf16.vlgmr.msra.gmra.mxu0 %vm471_vm3, %v918_v25 }
 0xad3   :  { %1080 = vmatpush1.bf16.msra.mxu0 %v2122_v30  ;;  %1099 = vmatprep.mubr.bf16.mxu0 %v2008_v33 }
 0xad4   :  { %1081 = vmatprep.subr.bf16.mxu0 %v2127_v31 }
 0xad7   :  { %1082 = vmatpush1.bf16.msra.mxu0 %v2134_v32  ;;  %v846_v27 = vpop.permute.xlu1 %845 }
 0xad8   :  { %1224 = vmatprep.subr.bf16.mxu0 %v2112_v28  ;;  %1804 = vmatmul.mubr.msk.bf16.vlgmr.msra.gmra.mxu1 %vm471_vm3, %v846_v27 }
 0xad9   :  { %1808 = vmatpush3.bf16.msra.mxu1 %v2190_v34  ;;  %1811 = vmatprep.mubr.msk.bf16.mxu1 %vm2001_vm1, %v2000_v0 }
 0xada   :  { %1809 = vmatprep.subr.bf16.mxu1 %v2000_v0 }
 0xadd   :  { %1810 = vmatpush3.bf16.msra.mxu1 %v2197_v35 }
 0xade   :  { %1815 = vmatprep.subr.bf16.mxu1 %v2000_v0 }
 0xb92   :  { %v956_v14 = vpop.f32.mrf.mxu0 }
 0xb93   :  { %v1035_v29 = vadd.f32 %v956_v14, %v282_v17 }
 0xb94   :  { %v958_v2 = vpop.f32.mrf.mxu0 }
 0xb95   :  { %1926 = vtanh.f32 %v1035_v29  ;;  %v1676_v43 = vmul.f32 -1.442695, %v1035_v29 }
 0xb96   :  { %v960_v36 = vpop.f32.mrf.mxu0 }
 0xb98   :  { %v961_v38 = vpop.f32.mrf.mxu0  ;;  %v884_v18 = vpop.f32.mrf.mxu1 }
 0xb99   :  { %v885_v40 = vadd.f32 %v2156_v53, %v884_v18 }
 0xb9a   :  { %v1805_v41 = vpop.f32.mrf.mxu1 }
 0xb9b   :  { %v963_v44 = vadd.f32 %v958_v2, %v885_v40 }
 0xb9c   :  { %v887_v45 = vpop.f32.mrf.mxu1 }
 0xb9d   :  { %1928 = vtanh.f32 %v963_v44  ;;  %v1674_v51 = vmul.f32 -1.442695, %v963_v44 }
 0xb9e   :  { %v1806_v46 = vpop.f32.mrf.mxu1  ;;  %1930 = vpow2.f32 %v1676_v43 }
 0xb9f   :  { %1932 = vpow2.f32 %v1674_v51 }
 0xba2   :  { %v1927_v49 = vpop.eup %1926 }
 0xba3   :  { %1045 = vrot.lane.b32.xlu0 %v1927_v49, %s2002_s0 }
 0xbaa   :  { %v1929_v50 = vpop.eup %1928 }
 0xbab   :  { %973 = vrot.lane.b32.xlu1 %v1929_v50, %s2002_s0  ;;  %v1931_v52 = vpop.eup %1930 }
 0xbac   :  { %v1039_v54 = vadd.f32 1.0, %v1931_v52  ;;  %v1933_v55 = vpop.eup %1932 }
 0xbad   :  { %v967_v56 = vadd.f32 1.0, %v1933_v55 }
 0xbae   :  { %1934 = vrcp.f32 %v1039_v54 }
 0xbaf   :  { %1936 = vrcp.f32 %v967_v56 }
 0xbbb   :  { %v1935_v57 = vpop.eup %1934 }
 0xbbc   :  { %v1937_v37 = vpop.eup %1936  ;;  %v1043_v62 = vmul.f32 %v1935_v57, %v2263_v11 }
 0xbbd   :  { %v971_v3 = vmul.f32 %v1937_v37, %v2267_v15 }
 0xc15   :  { %v1046_v58 = vpop.permute.xlu0 %1045 }
 0xc16   :  { %v1048_v59 = vmul.f32 %v1935_v57, %v1046_v58 }
 0xc18   :  { %1050 = vrot.lane.b32.xlu0 %v1048_v59, %s2003_s10 }
 0xc1d   :  { %v974_v60 = vpop.permute.xlu1 %973 }
 0xc1e   :  { %v976_v61 = vmul.f32 %v1937_v37, %v974_v60 }
 0xc20   :  { %978 = vrot.lane.b32.xlu1 %v976_v61, %s2003_s10 }
 0xc8a   :  { %v1051_v63 = vpop.permute.xlu0 %1050 }
 0xc8b   :  { %v2295_v1 = vadd.f32 %v1051_v63, %v1043_v62 }
 0xc8d   :  { %1938 = vtanh.f32 %v2295_v1 }
 0xc92   :  { %v979_v5 = vpop.permute.xlu1 %978 }
 0xc93   :  { %v2299_v39 = vadd.f32 %v979_v5, %v971_v3 }
 0xc95   :  { %1940 = vtanh.f32 %v2299_v39 }
 0xc9a   :  { %v1939_v6 = vpop.eup %1938 }
 0xc9b   :  { %1056 = vrot.lane.b32.xlu0 %v1939_v6, %s2002_s0  ;;  %v372_v6 = vadd.f32 %v2083_v4, %v2150_v47 }
 0xca2   :  { %v1941_v7 = vpop.eup %1940 }
 0xca3   :  { %984 = vrot.lane.b32.xlu1 %v1941_v7, %s2002_s0 }
 0xd0d   :  { %v1057_v8 = vpop.permute.xlu0 %1056 }
 0xd0e   :  { %v1059_v9 = vmul.f32 %v1935_v57, %v1057_v8 }
 0xd10   :  { %v1060_v10 = vpack.c.bf16 %v1059_v9, %v1059_v9 }
 0xd12   :  { %1062 = vrot.lane.b32.xlu0 %v1060_v10, %s2003_s10 }
 0xd15   :  { %v985_v11 = vpop.permute.xlu1 %984 }
 0xd16   :  { %v987_v12 = vmul.f32 %v1937_v37, %v985_v11 }
 0xd18   :  { %v988_v13 = vpack.c.bf16 %v987_v12, %v987_v12 }
 0xd1a   :  { %990 = vrot.lane.b32.xlu1 %v988_v13, %s2003_s10 }
 0xd84   :  { %v1063_v15 = vpop.permute.xlu0 %1062 }
 0xd85   :  { %1677 = vmatmul.mubr.msk.bf16.vlgmr.msra.gmra.mxu0 %vm471_vm3, %v1063_v15 }
 0xd86   :  { %1225 = vmatpush1.bf16.msra.mxu0 %v2122_v30  ;;  %1244 = vmatprep.mubr.bf16.mxu0 %v2008_v33 }
 0xd87   :  { %1226 = vmatprep.subr.bf16.mxu0 %v2127_v31 }
 0xd8a   :  { %1227 = vmatpush1.bf16.msra.mxu0 %v2134_v32 }
 0xd8b   :  { %1369 = vmatprep.subr.bf16.mxu0 %v2112_v28 }
 0xd8c   :  { %v991_v16 = vpop.permute.xlu1 %990 }
 0xd8d   :  { %1812 = vmatmul.mubr.msk.bf16.vlgmr.msra.gmra.mxu1 %vm471_vm3, %v991_v16 }
 0xd8e   :  { %1816 = vmatpush3.bf16.msra.mxu1 %v2190_v34  ;;  %1819 = vmatprep.mubr.msk.bf16.mxu1 %vm2001_vm1, %v2000_v0 }
 0xd8f   :  { %1817 = vmatprep.subr.bf16.mxu1 %v2000_v0 }
 0xd92   :  { %1818 = vmatpush3.bf16.msra.mxu1 %v2197_v35 }
 0xd93   :  { %1823 = vmatprep.subr.bf16.mxu1 %v2000_v0 }
 0xe45   :  { %v1101_v21 = vpop.f32.mrf.mxu0 }
 0xe46   :  { %v1180_v20 = vadd.f32 %v1101_v21, %v327_v19 }
 0xe47   :  { %v1103_v22 = vpop.f32.mrf.mxu0 }
 0xe48   :  { %1942 = vtanh.f32 %v1180_v20  ;;  %v1680_v42 = vmul.f32 -1.442695, %v1180_v20 }
 0xe49   :  { %v1105_v23 = vpop.f32.mrf.mxu0 }
 0xe4b   :  { %v1106_v24 = vpop.f32.mrf.mxu0 }
 0xe4d   :  { %v1029_v26 = vpop.f32.mrf.mxu1 }
 0xe4e   :  { %v1030_v25 = vadd.f32 %v2156_v53, %v1029_v26 }
 0xe4f   :  { %v1813_v27 = vpop.f32.mrf.mxu1 }
 0xe50   :  { %v1108_v17 = vadd.f32 %v1103_v22, %v1030_v25 }
 0xe51   :  { %v1032_v14 = vpop.f32.mrf.mxu1 }
 0xe52   :  { %1944 = vtanh.f32 %v1108_v17  ;;  %v1678_v38 = vmul.f32 -1.442695, %v1108_v17 }
 0xe53   :  { %v1814_v29 = vpop.f32.mrf.mxu1  ;;  %1946 = vpow2.f32 %v1680_v42 }
 0xe54   :  { %1948 = vpow2.f32 %v1678_v38 }
 0xe55   :  { %v1943_v2 = vpop.eup %1942 }
 0xe56   :  { %1190 = vrot.lane.b32.xlu0 %v1943_v2, %s2002_s0 }
 0xe5f   :  { %v1945_v36 = vpop.eup %1944 }
 0xe60   :  { %1118 = vrot.lane.b32.xlu1 %v1945_v36, %s2002_s0  ;;  %v1947_v18 = vpop.eup %1946 }
 0xe61   :  { %v1184_v40 = vadd.f32 1.0, %v1947_v18  ;;  %v1949_v41 = vpop.eup %1948 }
 0xe62   :  { %v1112_v44 = vadd.f32 1.0, %v1949_v41 }
 0xe63   :  { %1950 = vrcp.f32 %v1184_v40 }
 0xe64   :  { %1952 = vrcp.f32 %v1112_v44 }
 0xe70   :  { %v1951_v45 = vpop.eup %1950 }
 0xe71   :  { %v1953_v50 = vpop.eup %1952  ;;  %v1188_v52 = vmul.f32 %v1951_v45, %v2295_v1 }
 0xe72   :  { %v1116_v56 = vmul.f32 %v1953_v50, %v2299_v39 }
 0xec8   :  { %v1191_v46 = vpop.permute.xlu0 %1190 }
 0xec9   :  { %v1193_v49 = vmul.f32 %v1951_v45, %v1191_v46 }
 0xecb   :  { %1195 = vrot.lane.b32.xlu0 %v1193_v49, %s2003_s10 }
 0xed2   :  { %v1119_v43 = vpop.permute.xlu1 %1118 }
 0xed3   :  { %v1121_v51 = vmul.f32 %v1953_v50, %v1119_v43 }
 0xed5   :  { %1123 = vrot.lane.b32.xlu1 %v1121_v51, %s2003_s10 }
 0xf3d   :  { %v1196_v54 = vpop.permute.xlu0 %1195 }
 0xf3e   :  { %v2327_v55 = vadd.f32 %v1196_v54, %v1188_v52 }
 0xf40   :  { %1954 = vtanh.f32 %v2327_v55 }
 0xf47   :  { %v1124_v57 = vpop.permute.xlu1 %1123 }
 0xf48   :  { %v2331_v58 = vadd.f32 %v1124_v57, %v1116_v56 }
 0xf4a   :  { %1956 = vtanh.f32 %v2331_v58 }
 0xf4d   :  { %v1955_v59 = vpop.eup %1954 }
 0xf4e   :  { %1201 = vrot.lane.b32.xlu0 %v1955_v59, %s2002_s0 }
 0xf57   :  { %v1957_v37 = vpop.eup %1956 }
 0xf58   :  { %1129 = vrot.lane.b32.xlu1 %v1957_v37, %s2002_s0 }
 0xfc0   :  { %v1202_v60 = vpop.permute.xlu0 %1201 }
 0xfc1   :  { %v1204_v61 = vmul.f32 %v1951_v45, %v1202_v60 }
 0xfc3   :  { %v1205_v62 = vpack.c.bf16 %v1204_v61, %v1204_v61 }
 0xfc5   :  { %1207 = vrot.lane.b32.xlu0 %v1205_v62, %s2003_s10 }
 0xfca   :  { %v1130_v63 = vpop.permute.xlu1 %1129 }
 0xfcb   :  { %v1132_v1 = vmul.f32 %v1953_v50, %v1130_v63 }
 0xfcd   :  { %v1133_v3 = vpack.c.bf16 %v1132_v1, %v1132_v1 }
 0xfcf   :  { %1135 = vrot.lane.b32.xlu1 %v1133_v3, %s2003_s10 }
0x1037   :  { %v1208_v5 = vpop.permute.xlu0 %1207 }
0x1038   :  { %1681 = vmatmul.mubr.msk.bf16.vlgmr.msra.gmra.mxu0 %vm471_vm3, %v1208_v5 }
0x1039   :  { %1370 = vmatpush1.bf16.msra.mxu0 %v2122_v30  ;;  %1389 = vmatprep.mubr.bf16.mxu0 %v2008_v33 }
0x103a   :  { %1371 = vmatprep.subr.bf16.mxu0 %v2127_v31 }
0x103d   :  { %1372 = vmatpush1.bf16.msra.mxu0 %v2134_v32 }
0x103e   :  { %1514 = vmatprep.subr.bf16.mxu0 %v2112_v28 }
0x1041   :  { %v1136_v39 = vpop.permute.xlu1 %1135 }
0x1042   :  { %1820 = vmatmul.mubr.msk.bf16.vlgmr.msra.gmra.mxu1 %vm471_vm3, %v1136_v39 }
0x1043   :  { %1824 = vmatpush3.bf16.msra.mxu1 %v2190_v34  ;;  %1827 = vmatprep.mubr.msk.bf16.mxu1 %vm2001_vm1, %v2000_v0 }
0x1044   :  { %1825 = vmatprep.subr.bf16.mxu1 %v2000_v0 }
0x1047   :  { %1826 = vmatpush3.bf16.msra.mxu1 %v2197_v35 }
0x1048   :  { %1831 = vmatprep.subr.bf16.mxu1 %v2000_v0 }
0x10f8   :  { %v1246_v7 = vpop.f32.mrf.mxu0 }
0x10f9   :  { %v1325_v8 = vadd.f32 %v1246_v7, %v372_v6 }
0x10fa   :  { %v1248_v28 = vpop.f32.mrf.mxu0 }
0x10fb   :  { %1958 = vtanh.f32 %v1325_v8  ;;  %v1684_v4 = vmul.f32 -1.442695, %v1325_v8 }
0x10fc   :  { %v1250_v9 = vpop.f32.mrf.mxu0 }
0x10fe   :  { %v1251_v10 = vpop.f32.mrf.mxu0 }
0x1102   :  { %v1174_v11 = vpop.f32.mrf.mxu1 }
0x1103   :  { %v1175_v12 = vadd.f32 %v2156_v53, %v1174_v11 }
0x1104   :  { %v1821_v13 = vpop.f32.mrf.mxu1 }
0x1105   :  { %v1253_v15 = vadd.f32 %v1248_v28, %v1175_v12 }
0x1106   :  { %v1177_v16 = vpop.f32.mrf.mxu1 }
0x1107   :  { %1960 = vtanh.f32 %v1253_v15  ;;  %v1682_v47 = vmul.f32 -1.442695, %v1253_v15 }
0x1108   :  { %v1959_v19 = vpop.eup %1958  ;;  %v1822_v21 = vpop.f32.mrf.mxu1  ;;  %1962 = vpow2.f32 %v1684_v4 }
0x1109   :  { %1335 = vrot.lane.b32.xlu0 %v1959_v19, %s2002_s0  ;;  %1964 = vpow2.f32 %v1682_v47 }
0x1114   :  { %v1961_v20 = vpop.eup %1960 }
0x1115   :  { %1263 = vrot.lane.b32.xlu1 %v1961_v20, %s2002_s0  ;;  %v1963_v22 = vpop.eup %1962 }
0x1116   :  { %v1329_v23 = vadd.f32 1.0, %v1963_v22  ;;  %v1965_v24 = vpop.eup %1964 }
0x1117   :  { %v1257_v26 = vadd.f32 1.0, %v1965_v24 }
0x1118   :  { %1966 = vrcp.f32 %v1329_v23 }
0x1119   :  { %1968 = vrcp.f32 %v1257_v26 }
0x1125   :  { %v1967_v25 = vpop.eup %1966 }
0x1126   :  { %v1969_v14 = vpop.eup %1968  ;;  %v1333_v36 = vmul.f32 %v1967_v25, %v2327_v55 }
0x1127   :  { %v1261_v18 = vmul.f32 %v1969_v14, %v2331_v58 }
0x117b   :  { %v1336_v27 = vpop.permute.xlu0 %1335 }
0x117c   :  { %v1338_v17 = vmul.f32 %v1967_v25, %v1336_v27 }
0x117e   :  { %1340 = vrot.lane.b32.xlu0 %v1338_v17, %s2003_s10 }
0x1187   :  { %v1264_v29 = vpop.permute.xlu1 %1263 }
0x1188   :  { %v1266_v2 = vmul.f32 %v1969_v14, %v1264_v29 }
0x118a   :  { %1268 = vrot.lane.b32.xlu1 %v1266_v2, %s2003_s10 }
0x11f0   :  { %v1341_v42 = vpop.permute.xlu0 %1340 }
0x11f1   :  { %v2359_v38 = vadd.f32 %v1341_v42, %v1333_v36  ;;  %v1999_v42 = vld [vmem:[%s2426_s5] ss:$0 sm:$0xff] }
0x11f3   :  { %1970 = vtanh.f32 %v2359_v38 }
0x11fc   :  { %v1269_v40 = vpop.permute.xlu1 %1268 }
0x11fd   :  { %v2363_v41 = vadd.f32 %v1269_v40, %v1261_v18 }
0x11ff   :  { %1972 = vtanh.f32 %v2363_v41 }
0x1200   :  { %v1971_v44 = vpop.eup %1970 }
0x1201   :  { %1346 = vrot.lane.b32.xlu0 %v1971_v44, %s2002_s0 }
0x120c   :  { %v1973_v45 = vpop.eup %1972 }
0x120d   :  { %1274 = vrot.lane.b32.xlu1 %v1973_v45, %s2002_s0 }
0x1273   :  { %v1347_v46 = vpop.permute.xlu0 %1346 }
0x1274   :  { %v1349_v49 = vmul.f32 %v1967_v25, %v1347_v46 }
0x1276   :  { %v1350_v50 = vpack.c.bf16 %v1349_v49, %v1349_v49 }
0x1278   :  { %1352 = vrot.lane.b32.xlu0 %v1350_v50, %s2003_s10 }
0x127f   :  { %v1275_v43 = vpop.permute.xlu1 %1274 }
0x1280   :  { %v1277_v51 = vmul.f32 %v1969_v14, %v1275_v43 }
0x1282   :  { %v1278_v52 = vpack.c.bf16 %v1277_v51, %v1277_v51 }
0x1284   :  { %1280 = vrot.lane.b32.xlu1 %v1278_v52, %s2003_s10 }
0x12ea   :  { %v1353_v54 = vpop.permute.xlu0 %1352 }
0x12eb   :  { %1685 = vmatmul.mubr.msk.bf16.vlgmr.msra.gmra.mxu0 %vm471_vm3, %v1353_v54 }
0x12ec   :  { %1515 = vmatpush1.bf16.msra.mxu0 %v2122_v30  ;;  %1534 = vmatprep.mubr.bf16.mxu0 %v2008_v33  ;;  %v1998_v30 = vld [vmem:[%s2424_s2] ss:$0 sm:$0xff] }
0x12ed   :  { %1516 = vmatprep.subr.bf16.mxu0 %v2127_v31  ;;  %v417_v31 = vadd.f32 %v1998_v30, %v2221_v48 }
0x12f0   :  { %1517 = vmatpush1.bf16.msra.mxu0 %v2134_v32 }
0x12f6   :  { %v1281_v55 = vpop.permute.xlu1 %1280 }
0x12f7   :  { %1828 = vmatmul.mubr.msk.bf16.vlgmr.msra.gmra.mxu1 %vm471_vm3, %v1281_v55 }
0x12f8   :  { %1832 = vmatpush3.bf16.msra.mxu1 %v2190_v34  ;;  %1835 = vmatprep.mubr.msk.bf16.mxu1 %vm2001_vm1, %v2000_v0 }
0x12f9   :  { %1833 = vmatprep.subr.bf16.mxu1 %v2000_v0 }
0x12fc   :  { %1834 = vmatpush3.bf16.msra.mxu1 %v2197_v35 }
0x12fd   :  { %1839 = vmatprep.subr.bf16.mxu1 %v2000_v0 }
0x13ab   :  { %v1391_v32 = vpop.f32.mrf.mxu0 }
0x13ac   :  { %v1470_v33 = vadd.f32 %v1391_v32, %v417_v31  ;;  %v1868_v31 = vld [vmem:[%s2428_s6 + $0x8] sm:$0xff]   ;;  %v1869_v32 = vld [vmem:[%s2428_s6] sm:$0xff]  }
0x13ad   :  { %v1393_v56 = vpop.f32.mrf.mxu0 }
0x13ae   :  { %1974 = vtanh.f32 %v1470_v33  ;;  %v1688_v48 = vmul.f32 -1.442695, %v1470_v33 }
0x13af   :  { %v1395_v34 = vpop.f32.mrf.mxu0 }
0x13b1   :  { %v1396_v57 = vpop.f32.mrf.mxu0 }
0x13b7   :  { %v1319_v58 = vpop.f32.mrf.mxu1 }
0x13b8   :  { %v1320_v59 = vadd.f32 %v2156_v53, %v1319_v58 }
0x13b9   :  { %v1829_v37 = vpop.f32.mrf.mxu1 }
0x13ba   :  { %v1398_v35 = vadd.f32 %v1393_v56, %v1320_v59  ;;  %v13_v56 = vstv %s2429_s7 }
0x13bb   :  { %v1975_v60 = vpop.eup %1974  ;;  %v1322_v61 = vpop.f32.mrf.mxu1  ;;  %14 = vst [vmem:[#allocation2] sm:$0x1] %v13_v56 }
0x13bc   :  { %1480 = vrot.lane.b32.xlu0 %v1975_v60, %s2002_s0  ;;  %1976 = vtanh.f32 %v1398_v35  ;;  %v1686_v1 = vmul.f32 -1.442695, %v1398_v35 }
0x13bd   :  { %v1830_v62 = vpop.f32.mrf.mxu1  ;;  %1978 = vpow2.f32 %v1688_v48 }
0x13be   :  { %1980 = vpow2.f32 %v1686_v1 }
0x13c2   :  { %v1691_v37 = vld [vmem:[#allocation2] ss:$0 sm:$0xff] }
0x13c9   :  { %v1977_v63 = vpop.eup %1976 }
0x13ca   :  { %1408 = vrot.lane.b32.xlu1 %v1977_v63, %s2002_s0  ;;  %v1979_v3 = vpop.eup %1978 }
0x13cb   :  { %v1474_v5 = vadd.f32 1.0, %v1979_v3  ;;  %v1981_v39 = vpop.eup %1980 }
0x13cc   :  { %v1402_v53 = vadd.f32 1.0, %v1981_v39 }
0x13cd   :  { %1982 = vrcp.f32 %v1474_v5 }
0x13ce   :  { %1984 = vrcp.f32 %v1402_v53 }
0x13da   :  { %v1983_v6 = vpop.eup %1982 }
0x13db   :  { %v1985_v28 = vpop.eup %1984  ;;  %v1478_v11 = vmul.f32 %v1983_v6, %v2359_v38 }
0x13dc   :  { %v1406_v15 = vmul.f32 %v1985_v28, %v2363_v41 }
0x142e   :  { %v1481_v7 = vpop.permute.xlu0 %1480 }
0x142f   :  { %v1483_v8 = vmul.f32 %v1983_v6, %v1481_v7 }
0x1431   :  { %1485 = vrot.lane.b32.xlu0 %v1483_v8, %s2003_s10 }
0x143c   :  { %v1409_v9 = vpop.permute.xlu1 %1408 }
0x143d   :  { %v1411_v10 = vmul.f32 %v1985_v28, %v1409_v9 }
0x143f   :  { %1413 = vrot.lane.b32.xlu1 %v1411_v10, %s2003_s10 }
0x14a3   :  { %v1486_v12 = vpop.permute.xlu0 %1485 }
0x14a4   :  { %v1488_v13 = vadd.f32 %v1486_v12, %v1478_v11 }
0x14a6   :  { %1986 = vtanh.f32 %v1488_v13 }
0x14b1   :  { %v1414_v16 = vpop.permute.xlu1 %1413 }
0x14b2   :  { %v1416_v21 = vadd.f32 %v1414_v16, %v1406_v15 }
0x14b3   :  { %v1987_v19 = vpop.eup %1986 }
0x14b4   :  { %1491 = vrot.lane.b32.xlu0 %v1987_v19, %s2002_s0  ;;  %1988 = vtanh.f32 %v1416_v21 }
0x14c1   :  { %v1989_v20 = vpop.eup %1988 }
0x14c2   :  { %1419 = vrot.lane.b32.xlu1 %v1989_v20, %s2002_s0 }
0x1526   :  { %v1492_v4 = vpop.permute.xlu0 %1491 }
0x1527   :  { %v1494_v47 = vmul.f32 %v1983_v6, %v1492_v4 }
0x1529   :  { %v1495_v22 = vpack.c.bf16 %v1494_v47, %v1494_v47 }
0x152b   :  { %1497 = vrot.lane.b32.xlu0 %v1495_v22, %s2003_s10 }
0x1534   :  { %v1420_v23 = vpop.permute.xlu1 %1419 }
0x1535   :  { %v1422_v24 = vmul.f32 %v1985_v28, %v1420_v23 }
0x1537   :  { %v1423_v26 = vpack.c.bf16 %v1422_v24, %v1422_v24 }
0x1539   :  { %1425 = vrot.lane.b32.xlu1 %v1423_v26, %s2003_s10 }
0x159d   :  { %v1498_v25 = vpop.permute.xlu0 %1497 }
0x159e   :  { %1689 = vmatmul.mubr.msk.bf16.vlgmr.msra.gmra.mxu0 %vm471_vm3, %v1498_v25 }
0x15ab   :  { %v1426_v27 = vpop.permute.xlu1 %1425 }
0x15ac   :  { %1836 = vmatmul.mubr.msk.bf16.vlgmr.msra.gmra.mxu1 %vm471_vm3, %v1426_v27 }
0x15ad   :  { %1843 = vmatprep.mubr.msk.bf16.mxu1 %vm2001_vm1, %v2000_v0  ;;  %1840 = vmatpush3.bf16.msra.mxu1 %v1868_v31 }
0x15ae   :  { %1841 = vmatprep.subr.bf16.mxu1 %v2000_v0 }
0x15b1   :  { %1842 = vmatpush3.bf16.msra.mxu1 %v1869_v32 }
0x165e   :  { %v1536_v17 = vpop.f32.mrf.mxu0 }
0x1660   :  { %v1537_v14 = vpop.f32.mrf.mxu0 }
0x1662   :  { %v1539_v29 = vpop.f32.mrf.mxu0 }
0x1664   :  { %v1540_v2 = vpop.f32.mrf.mxu0 }
0x166c   :  { %v1464_v36 = vpop.f32.mrf.mxu1 }
0x166d   :  { %v1465_v38 = vadd.f32 %v1999_v42, %v1464_v36 }
0x166e   :  { %v1837_v18 = vpop.f32.mrf.mxu1 }
0x166f   :  { %v1542_v40 = vadd.f32 %v1537_v14, %v1465_v38 }
0x1670   :  { %v1467_v41 = vpop.f32.mrf.mxu1 }
0x1671   :  { %1990 = vtanh.f32 %v1542_v40  ;;  %v1690_v46 = vmul.f32 -1.442695, %v1542_v40 }
0x1672   :  { %v1838_v44 = vpop.f32.mrf.mxu1 }
0x1673   :  { %1992 = vpow2.f32 %v1690_v46 }
0x167e   :  { %v1991_v45 = vpop.eup %1990 }
0x167f   :  { %1552 = vrot.lane.b32.xlu1 %v1991_v45, %s2002_s0 }
0x1680   :  { %v1993_v49 = vpop.eup %1992 }
0x1681   :  { %v1546_v50 = vadd.f32 1.0, %v1993_v49 }
0x1683   :  { %1994 = vrcp.f32 %v1546_v50 }
0x1690   :  { %v1995_v43 = vpop.eup %1994 }
0x1691   :  { %v1550_v54 = vmul.f32 %v1995_v43, %v1416_v21 }
0x16f1   :  { %v1553_v51 = vpop.permute.xlu1 %1552 }
0x16f2   :  { %v1555_v52 = vmul.f32 %v1995_v43, %v1553_v51 }
0x16f4   :  { %1557 = vrot.lane.b32.xlu0 %v1555_v52, %s2003_s10 }
0x1766   :  { %v1558_v55 = vpop.permute.xlu0 %1557 }
0x1767   :  { %v1560_v30 = vadd.f32 %v1558_v55, %v1550_v54 }
0x1769   :  { %1996 = vtanh.f32 %v1560_v30 }
0x1776   :  { %v1997_v33 = vpop.eup %1996 }
0x1777   :  { %1563 = vrot.lane.b32.xlu1 %v1997_v33, %s2002_s0 }
0x17e9   :  { %v1564_v34 = vpop.permute.xlu1 %1563 }
0x17ea   :  { %v1566_v57 = vmul.f32 %v1995_v43, %v1564_v34 }
0x17ec   :  { %v1567_v58 = vpack.c.bf16 %v1566_v57, %v1566_v57 }
0x17ee   :  { %1580 = vrot.lane.b32.xlu0 %v1567_v58, %s2003_s10 }
0x1860   :  { %v1581_v59 = vpop.permute.xlu0 %1580 }
0x1861   :  { %1844 = vmatmul.mubr.msk.bf16.vlgmr.msra.gmra.mxu1 %vm471_vm3, %v1581_v59 }
0x1921   :  { %v1631_v60 = vpop.f32.mrf.mxu1 }
0x1922   :  { %v1632_v0 = vadd.f32 %v1691_v37, %v1631_v60 }
0x1923   :  { %v1845_v35 = vpop.f32.mrf.mxu1 }
0x1924   :  { %1638 = vst.msk [vmem:[%s2430_s8] sm:$0xff] %vm1637_vm4, %v1632_v0 }
0x1925   :  { %v1634_v61 = vpop.f32.mrf.mxu1 }
0x1927   :  { %v1846_v62 = vpop.f32.mrf.mxu1 }

</bundles_post_ra>
